<compile_context>
chip_gen: v6e
topology: v6e:2x2x1
jax: 0.10.0
libtpu: 0.0.40
codegen_flags: <defaults>
</compile_context>

<pallas_src>
import functools

import jax
import jax.numpy as jnp
from jax.experimental import pallas as pl
from jax.experimental.pallas import tpu as pltpu


# ----------------------------------------------------------------------------
# small helpers
# ----------------------------------------------------------------------------
def _round_up(x, m):
    return ((x + m - 1) // m) * m


def _cdiv(a, b):
    return -(-a // b)


def _default_tq_max():
    # 128 MiB-VMEM parts (v5e / v6e) can take bigger query tiles to amortize
    # the ~0.35 us per-grid-step overhead; 64 MiB parts (v7x) stay conservative.
    try:
        kind = jax.devices()[0].device_kind.lower()
    except Exception:  # pragma: no cover - defensive
        return 512
    if ("v5 lite" in kind) or ("v5e" in kind) or ("v6" in kind):
        return 1024
    return 512


def _tile_bytes(rows, cols, itemsize=4):
    # VMEM blocks are padded to (8, 128) tiles.
    return _round_up(max(int(rows), 1), 8) * _round_up(max(int(cols), 1), 128) * itemsize


def _vmem_limit_bytes(tq, F, E, H, P, Do):
    PHF, HPE = P * H * F, H * P * E
    io = 2 * (_tile_bytes(tq, 3) + _tile_bytes(tq, Do))            # double-buffered IO
    w = 2 * (_tile_bytes(3, PHF) + _tile_bytes(F, PHF + E) + _tile_bytes(1, PHF + E)
             + _tile_bytes(PHF, 2 * HPE) + _tile_bytes(1, 2 * HPE)
             + _tile_bytes(H * E, Do) + _tile_bytes(1, Do))        # weights (conservative x2)
    inter = 8 * _tile_bytes(tq, max(PHF + E, 2 * HPE))             # zz/qa/aux/kv/k/v slabs
    need = int(1.5 * (io + w + inter))
    # stay below v7x's 64 MiB physical VMEM, leave compiler-scratch headroom
    return max(8 * 1024 * 1024, min(need, 56 * 1024 * 1024))


# ----------------------------------------------------------------------------
# feature_sampler: injected dependency of the original module.  Deterministic
# stand-in: tanh(pos @ Ws) (`c` unused).  The same math (including at the
# deformed points) is folded algebraically into the fused kernel below.
# ----------------------------------------------------------------------------
def feature_sampler(query_pos, c, sampler_w):
    del c
    return jnp.tanh(query_pos @ sampler_w)


# ----------------------------------------------------------------------------
# Single fused Pallas kernel: sampler + to_offset fold + re-sampler + q/k/v
# projections + deformable attention + to_out + residual, per query block.
# ----------------------------------------------------------------------------
def _deformable_attn_kernel(pos_ref, wst_ref, wmg_ref, bmg_ref,
                            wkv_ref, bkv_ref, wo_ref, bo_ref, out_ref,
                            *, num_heads, num_points, feature_dim, embed_dim):
    H, P, F, E = num_heads, num_points, feature_dim, embed_dim
    PHF = P * H * F
    HPE = H * P * E

    pos = pos_ref[...].astype(jnp.float32)                       # (Tq, 3)
    wst = wst_ref[...].astype(jnp.float32)                       # (3, PHF)  Ws tiled per point

    # pos @ Ws replicated per sample point as a 3-term VPU FMA (K=3 would
    # waste a whole MXU pass).  The first F lanes are exactly pos @ Ws.
    zz = (pos[:, 0:1] * wst[0:1, :]
          + pos[:, 1:2] * wst[1:2, :]
          + pos[:, 2:3] * wst[2:3, :])                           # (Tq, PHF)
    feat = jnp.tanh(zz[:, :F])                                   # (Tq, F) query features

    # One wide matmul: [Wcomb | Wq*sqrt(E)].  Wcomb = Woff·Ws folds the
    # to_offset projection straight through the sampler, so the deformed
    # coordinates never materialize; the sqrt(E) query scale is pre-folded.
    qa = jnp.dot(feat.astype(wmg_ref.dtype), wmg_ref[...],
                 preferred_element_type=jnp.float32) + bmg_ref[...]   # (Tq, PHF + E)
    aux = jnp.tanh(qa[:, :PHF] + zz)                             # (Tq, PHF) sampled features
    q = qa[:, PHF:]                                              # (Tq, E)   scaled query

    # Block-diagonal (head-major) K|V projection: K = P*H*F lanes fills the
    # MXU and the output is already laid out (H, P, E) — no (., F) reshape.
    kv = jnp.dot(aux.astype(wkv_ref.dtype), wkv_ref[...],
                 preferred_element_type=jnp.float32) + bkv_ref[...]   # (Tq, 2*HPE)

    Tq = feat.shape[0]
    k = kv[:, :HPE].reshape(Tq * H, P, E)
    v = kv[:, HPE:].reshape(Tq * H, P, E)
    if H == 1:
        q3 = q                                                   # (Tq*H, E)
    else:
        # reference broadcasts the same q across heads
        q3 = jnp.broadcast_to(q[:, None, :], (Tq, H, E)).reshape(Tq * H, E)

    sim = jnp.sum(q3[:, None, :] * k, axis=-1)                   # (Tq*H, P)
    sim = sim - jnp.max(sim, axis=-1, keepdims=True)
    e = jnp.exp(sim)
    attn = e * pl.reciprocal(jnp.sum(e, axis=-1, keepdims=True), approx=False)
    # TODO(synk): nn.Dropout(p=0.1) on attn omitted (inference semantics: identity).

    out_h = jnp.sum(attn[:, :, None] * v, axis=1)                # (Tq*H, E)
    out_flat = out_h.reshape(Tq, H * E)                          # head-concat, torch order

    o = jnp.dot(out_flat.astype(wo_ref.dtype), wo_ref[...],
                preferred_element_type=jnp.float32) + bo_ref[...]
    out_ref[...] = (o + feat).astype(out_ref.dtype)              # residual (out_dim == F)


# ----------------------------------------------------------------------------
# Wrapper: one-time parameter transforms + single pallas_call
# ----------------------------------------------------------------------------
def deformable_attn_forward(query_pos, c, params, *, num_heads=1, sp=2,
                            tq_max=None, act_dtype=jnp.float32):
    del c
    bs, ns, _ = query_pos.shape
    F, E = params["Wq"].shape
    H = num_heads
    P = sp * sp * sp
    PHF = P * H * F
    HPE = H * P * E
    Do = params["Wo"].shape[1]
    Nq = bs * ns

    if tq_max is None:
        tq_max = _default_tq_max()

    # Tile sizing: >= 2 grid blocks (both v7x TensorCores get work) with
    # minimal tail padding; rounded to the 8-row sublane granule.
    n_blocks = max(2, _cdiv(Nq, tq_max))
    tq = min(_round_up(_cdiv(Nq, n_blocks), 8), _round_up(Nq, 8))
    Nq_pad = _round_up(Nq, tq)

    pos = query_pos.reshape(Nq, 3).astype(jnp.float32)
    pos = jnp.pad(pos, ((0, Nq_pad - Nq), (0, 0)))

    # ---- one-time parameter transforms (outside the hot loop) ----
    Ws = params["Ws"].astype(jnp.float32)                        # (3, F)
    wst = jnp.tile(Ws, (1, P * H))                               # (3, PHF)

    # Fold to_offset through the (linear-then-tanh) sampler:
    #   tanh((off + pos) @ Ws) == tanh(feat @ (Woff·Ws) + boff·Ws + pos @ Ws)
    Wcomb = jnp.einsum("fpc,cg->fpg", params["Woff"].reshape(F, P * H, 3),
                       Ws).reshape(F, PHF)
    bcomb = (params["boff"].reshape(P * H, 3) @ Ws).reshape(1, PHF)

    scale = float(E) ** 0.5      # reference does q / (E**-0.5), i.e. multiply by sqrt(E)
    wmg = jnp.concatenate([Wcomb, params["Wq"] * scale], axis=1).astype(act_dtype)
    bmg = jnp.concatenate([bcomb, params["bq"] * scale], axis=1).astype(jnp.float32)

    # Block-diagonal K|V with the (p,h)->(h,p) head-major permutation baked in.
    src = jnp.arange(P * H)
    perm = jnp.zeros((P * H, H * P), jnp.float32).at[src, (src % H) * P + src // H].set(1.0)
    Wk_bd = jnp.einsum("ij,fe->ifje", perm, params["Wk"]).reshape(PHF, HPE)
    Wv_bd = jnp.einsum("ij,fe->ifje", perm, params["Wv"]).reshape(PHF, HPE)
    wkv = jnp.concatenate([Wk_bd, Wv_bd], axis=1).astype(act_dtype)       # (PHF, 2*HPE)
    bkv = jnp.concatenate([jnp.tile(params["bk"], (1, H * P)),
                           jnp.tile(params["bv"], (1, H * P))], axis=1).astype(jnp.float32)

    wo = params["Wo"].astype(act_dtype)
    bo = params["bo"].astype(jnp.float32)

    kernel = functools.partial(_deformable_attn_kernel, num_heads=H,
                               num_points=P, feature_dim=F, embed_dim=E)
    out = pl.pallas_call(
        kernel,
        out_shape=jax.ShapeDtypeStruct((Nq_pad, Do), jnp.float32),
        grid=(Nq_pad // tq,),
        in_specs=[
            pl.BlockSpec((tq, 3), lambda i: (i, 0)),             # query positions
            pl.BlockSpec((3, PHF), lambda i: (0, 0)),            # Ws tiled per point
            pl.BlockSpec((F, PHF + E), lambda i: (0, 0)),        # [Wcomb | Wq*sqrt(E)]
            pl.BlockSpec((1, PHF + E), lambda i: (0, 0)),
            pl.BlockSpec((PHF, 2 * HPE), lambda i: (0, 0)),      # block-diag [Wk | Wv]
            pl.BlockSpec((1, 2 * HPE), lambda i: (0, 0)),
            pl.BlockSpec((H * E, Do), lambda i: (0, 0)),         # Wo
            pl.BlockSpec((1, Do), lambda i: (0, 0)),
        ],
        out_specs=pl.BlockSpec((tq, Do), lambda i: (i, 0)),
        compiler_params=pltpu.CompilerParams(
            dimension_semantics=("parallel",),
            vmem_limit_bytes=_vmem_limit_bytes(tq, F, E, H, P, Do)),
    )(pos, wst, wmg, bmg, wkv, bkv, wo, bo)

    return out[:Nq].reshape(bs, ns, Do)


# ----------------------------------------------------------------------------
# Pure-JAX reference mirroring the PyTorch forward (no folds; correctness check)
# ----------------------------------------------------------------------------
def reference_forward(query_pos, params, *, num_heads=1, sp=2):
    bs, ns, _ = query_pos.shape
    F, E = params["Wq"].shape
    P = sp * sp * sp
    scale = float(E) ** (-0.5)

    feature = feature_sampler(query_pos, None, params["Ws"]).reshape(bs, ns, F)
    feat2 = feature.reshape(bs * ns, F)

    off = feat2 @ params["Woff"] + params["boff"][0]
    aux_pt = off.reshape(bs, ns, P, num_heads, 3) + query_pos.reshape(bs, ns, 1, 1, 3)
    aux_feat = feature_sampler(aux_pt.reshape(bs, -1, 3), None, params["Ws"])
    aux_feat = aux_feat.reshape(bs * ns, P, num_heads, F)

    k = jnp.swapaxes(aux_feat @ params["Wk"] + params["bk"][0], 1, 2)   # (b*n,H,P,E)
    v = jnp.swapaxes(aux_feat @ params["Wv"] + params["bv"][0], 1, 2)
    q = (feat2 @ params["Wq"] + params["bq"][0]).reshape(bs * ns, 1, 1, E)
    q = jnp.broadcast_to(q, (bs * ns, num_heads, 1, E)) / scale

    sim = jnp.einsum("bnid,bnjd->bnij", q, k)
    sim = sim - jnp.max(sim, axis=-1, keepdims=True)
    attn = jax.nn.softmax(sim, axis=-1)
    out = jnp.einsum("bnij,bnjd->bnid", attn, v)                        # (b*n,H,1,E)
    out = jnp.swapaxes(out, 1, 2).reshape(bs, ns, num_heads * E)
    out = out @ params["Wo"] + params["bo"][0]
    return out + feature


# ----------------------------------------------------------------------------
# Deterministic parameter construction (matches __init__ shapes / init scheme)
# ----------------------------------------------------------------------------
def make_params(key, feature_dim, out_dim, num_heads, sp, grid_scale):
    embed_dim = feature_dim // num_heads
    P = sp * sp * sp
    ks = jax.random.split(key, 6)

    def xavier_uniform(k, fan_in, fan_out, shape):
        bound = (6.0 / (fan_in + fan_out)) ** 0.5
        return jax.random.uniform(k, shape, jnp.float32, -bound, bound)

    Wq = xavier_uniform(ks[0], feature_dim, embed_dim, (feature_dim, embed_dim))
    Wk = xavier_uniform(ks[1], feature_dim, embed_dim, (feature_dim, embed_dim))
    Wv = xavier_uniform(ks[2], feature_dim, embed_dim, (feature_dim, embed_dim))
    Wo = xavier_uniform(ks[3], feature_dim, out_dim, (feature_dim, out_dim))
    bq = jnp.zeros((1, embed_dim), jnp.float32)
    bk = jnp.zeros((1, embed_dim), jnp.float32)
    bv = jnp.zeros((1, embed_dim), jnp.float32)
    bo = jnp.zeros((1, out_dim), jnp.float32)

    # to_offset : constant_init(weight=0), bias = normalized grid / grid_scale
    Woff = jnp.zeros((feature_dim, P * num_heads * 3), jnp.float32)
    coords = jnp.stack(
        jnp.meshgrid(jnp.arange(sp), jnp.arange(sp), jnp.arange(sp), indexing="ij"),
        axis=0,
    ).astype(jnp.float32)
    denom = float(max(sp - 1, 1))
    norm = 2.0 * coords / denom - 1.0
    grid_scaled = jnp.stack([norm[0], norm[1], norm[2]], axis=-1) / grid_scale
    grid_scaled = jnp.tile(grid_scaled[:, :, :, None, :], (1, 1, 1, num_heads, 1))
    boff = grid_scaled.reshape(1, -1)

    # synthetic feature_sampler weights (deterministic stand-in dependency)
    Ws = jax.random.normal(ks[4], (3, feature_dim), jnp.float32)

    return dict(Wq=Wq, bq=bq, Wk=Wk, bk=bk, Wv=Wv, bv=bv, Wo=Wo, bo=bo,
                Woff=Woff, boff=boff, Ws=Ws)


if __name__ == "__main__":
    bs, ns = 2, 8
    feature_dim = 32
    out_dim = 32                 # out_dim == feature_dim (residual add requires it)
    num_heads = 1
    sp = 2
    grid_scale = 80.0

    key = jax.random.PRNGKey(0)
    k_param, k_pos, k_off = jax.random.split(key, 3)
    params = make_params(k_param, feature_dim, out_dim, num_heads, sp, grid_scale)
    # The torch init zeroes to_offset.weight; perturb it here so the fused
    # Woff·Ws fold is actually exercised numerically (trained weights are nonzero).
    params["Woff"] = 0.05 * jax.random.normal(k_off, params["Woff"].shape, jnp.float32)

    query_pos = jax.random.normal(k_pos, (bs, ns, 3), jnp.float32)

    out = deformable_attn_forward(query_pos, None, params,
                                  num_heads=num_heads, sp=sp)
    out = jax.block_until_ready(out)

    with jax.default_matmul_precision("highest"):
        ref = reference_forward(query_pos, params, num_heads=num_heads, sp=sp)
    ref = jax.block_until_ready(ref)

    assert out.shape == (bs, ns, out_dim), out.shape
    assert jnp.allclose(out, ref, atol=1e-3, rtol=1e-3), float(
        jnp.max(jnp.abs(out - ref)))
    print("KERNEL_OK")
</pallas_src>

<mosaic_0001>
module attributes {stable_mosaic.version = 11 : i64} {
  func.func @_deformable_attn_kernel(%arg0: i32, %arg1: memref<8x3xf32, #tpu.memory_space<vmem>>, %arg2: memref<3x256xf32, #tpu.memory_space<vmem>>, %arg3: memref<32x288xf32, #tpu.memory_space<vmem>>, %arg4: memref<1x288xf32, #tpu.memory_space<vmem>>, %arg5: memref<256x512xf32, #tpu.memory_space<vmem>>, %arg6: memref<1x512xf32, #tpu.memory_space<vmem>>, %arg7: memref<32x32xf32, #tpu.memory_space<vmem>>, %arg8: memref<1x32xf32, #tpu.memory_space<vmem>>, %arg9: memref<8x32xf32, #tpu.memory_space<vmem>>) attributes {dimension_semantics = [#tpu.dimension_semantics<parallel>], iteration_bounds = array<i64: 2>, scalar_prefetch = 0 : i64, scratch_operands = 0 : i64, tpu.core_type = #tpu.core_type<tc>, window_params = [{transform_indices = @transform_0, window_bounds = array<i64: 8, 3>}, {pipeline_mode = #tpu.pipeline_mode<synchronous>, transform_indices = @transform_1, window_bounds = array<i64: 3, 256>}, {pipeline_mode = #tpu.pipeline_mode<synchronous>, transform_indices = @transform_2, window_bounds = array<i64: 32, 288>}, {pipeline_mode = #tpu.pipeline_mode<synchronous>, transform_indices = @transform_3, window_bounds = array<i64: 1, 288>}, {pipeline_mode = #tpu.pipeline_mode<synchronous>, transform_indices = @transform_4, window_bounds = array<i64: 256, 512>}, {pipeline_mode = #tpu.pipeline_mode<synchronous>, transform_indices = @transform_5, window_bounds = array<i64: 1, 512>}, {pipeline_mode = #tpu.pipeline_mode<synchronous>, transform_indices = @transform_6, window_bounds = array<i64: 32, 32>}, {pipeline_mode = #tpu.pipeline_mode<synchronous>, transform_indices = @transform_7, window_bounds = array<i64: 1, 32>}, {transform_indices = @transform_8, window_bounds = array<i64: 8, 32>}]} {
    %c0 = arith.constant 0 : index
    %c0_0 = arith.constant 0 : index
    %0 = vector.load %arg1[%c0, %c0_0] : memref<8x3xf32, #tpu.memory_space<vmem>>, vector<8x3xf32>
    %c0_1 = arith.constant 0 : index
    %c0_2 = arith.constant 0 : index
    %1 = vector.load %arg2[%c0_1, %c0_2] : memref<3x256xf32, #tpu.memory_space<vmem>>, vector<3x256xf32>
    %2 = vector.extract_strided_slice %0 {offsets = [0, 0], sizes = [8, 1], strides = [1, 1]} : vector<8x3xf32> to vector<8x1xf32>
    %3 = vector.extract_strided_slice %1 {offsets = [0, 0], sizes = [1, 256], strides = [1, 1]} : vector<3x256xf32> to vector<1x256xf32>
    %4 = vector.broadcast %2 : vector<8x1xf32> to vector<8x256xf32>
    %5 = vector.broadcast %3 : vector<1x256xf32> to vector<8x256xf32>
    %6 = arith.mulf %4, %5 : vector<8x256xf32>
    %7 = vector.extract_strided_slice %0 {offsets = [0, 1], sizes = [8, 1], strides = [1, 1]} : vector<8x3xf32> to vector<8x1xf32>
    %8 = vector.extract_strided_slice %1 {offsets = [1, 0], sizes = [1, 256], strides = [1, 1]} : vector<3x256xf32> to vector<1x256xf32>
    %9 = vector.broadcast %7 : vector<8x1xf32> to vector<8x256xf32>
    %10 = vector.broadcast %8 : vector<1x256xf32> to vector<8x256xf32>
    %11 = arith.mulf %9, %10 : vector<8x256xf32>
    %12 = arith.addf %6, %11 : vector<8x256xf32>
    %13 = vector.extract_strided_slice %0 {offsets = [0, 2], sizes = [8, 1], strides = [1, 1]} : vector<8x3xf32> to vector<8x1xf32>
    %14 = vector.extract_strided_slice %1 {offsets = [2, 0], sizes = [1, 256], strides = [1, 1]} : vector<3x256xf32> to vector<1x256xf32>
    %15 = vector.broadcast %13 : vector<8x1xf32> to vector<8x256xf32>
    %16 = vector.broadcast %14 : vector<1x256xf32> to vector<8x256xf32>
    %17 = arith.mulf %15, %16 : vector<8x256xf32>
    %18 = arith.addf %12, %17 : vector<8x256xf32>
    %19 = vector.extract_strided_slice %18 {offsets = [0, 0], sizes = [8, 32], strides = [1, 1]} : vector<8x256xf32> to vector<8x32xf32>
    %20 = math.tanh %19 : vector<8x32xf32>
    %c0_3 = arith.constant 0 : index
    %c0_4 = arith.constant 0 : index
    %21 = vector.load %arg3[%c0_3, %c0_4] : memref<32x288xf32, #tpu.memory_space<vmem>>, vector<32x288xf32>
    %cst = arith.constant dense<0.000000e+00> : vector<8x288xf32>
    %22 = tpu.matmul %20, %21, %cst {dimension_numbers = #tpu.dot_dimension_numbers<[1], [0], [0], [1], [0, 0, 1, 1], [], []>} : vector<8x32xf32>, vector<32x288xf32>, vector<8x288xf32> -> vector<8x288xf32>
    %c0_5 = arith.constant 0 : index
    %c0_6 = arith.constant 0 : index
    %23 = vector.load %arg4[%c0_5, %c0_6] : memref<1x288xf32, #tpu.memory_space<vmem>>, vector<1x288xf32>
    %24 = vector.broadcast %23 : vector<1x288xf32> to vector<8x288xf32>
    %25 = arith.addf %22, %24 : vector<8x288xf32>
    %26 = vector.extract_strided_slice %25 {offsets = [0, 0], sizes = [8, 256], strides = [1, 1]} : vector<8x288xf32> to vector<8x256xf32>
    %27 = arith.addf %26, %18 : vector<8x256xf32>
    %28 = math.tanh %27 : vector<8x256xf32>
    %29 = vector.extract_strided_slice %25 {offsets = [0, 256], sizes = [8, 32], strides = [1, 1]} : vector<8x288xf32> to vector<8x32xf32>
    %c0_7 = arith.constant 0 : index
    %c0_8 = arith.constant 0 : index
    %30 = vector.load %arg5[%c0_7, %c0_8] : memref<256x512xf32, #tpu.memory_space<vmem>>, vector<256x512xf32>
    %cst_9 = arith.constant dense<0.000000e+00> : vector<8x512xf32>
    %31 = tpu.matmul %28, %30, %cst_9 {dimension_numbers = #tpu.dot_dimension_numbers<[1], [0], [0], [1], [0, 0, 1, 1], [], []>} : vector<8x256xf32>, vector<256x512xf32>, vector<8x512xf32> -> vector<8x512xf32>
    %c0_10 = arith.constant 0 : index
    %c0_11 = arith.constant 0 : index
    %32 = vector.load %arg6[%c0_10, %c0_11] : memref<1x512xf32, #tpu.memory_space<vmem>>, vector<1x512xf32>
    %33 = vector.broadcast %32 : vector<1x512xf32> to vector<8x512xf32>
    %34 = arith.addf %31, %33 : vector<8x512xf32>
    %35 = vector.extract_strided_slice %34 {offsets = [0, 0], sizes = [8, 256], strides = [1, 1]} : vector<8x512xf32> to vector<8x256xf32>
    %36 = vector.shape_cast %35 : vector<8x256xf32> to vector<8x8x32xf32>
    %37 = vector.extract_strided_slice %34 {offsets = [0, 256], sizes = [8, 256], strides = [1, 1]} : vector<8x512xf32> to vector<8x256xf32>
    %38 = vector.shape_cast %37 : vector<8x256xf32> to vector<8x8x32xf32>
    %39 = vector.shape_cast %29 : vector<8x32xf32> to vector<8x1x32xf32>
    %40 = vector.broadcast %39 : vector<8x1x32xf32> to vector<8x8x32xf32>
    %41 = arith.mulf %40, %36 : vector<8x8x32xf32>
    %cst_12 = arith.constant dense<0.000000e+00> : vector<8x8xf32>
    %42 = vector.multi_reduction <add>, %41, %cst_12 [2] : vector<8x8x32xf32> to vector<8x8xf32>
    %cst_13 = arith.constant dense<0xFF800000> : vector<8xf32>
    %43 = vector.multi_reduction <maximumf>, %42, %cst_13 [1] : vector<8x8xf32> to vector<8xf32>
    %44 = vector.shape_cast %43 : vector<8xf32> to vector<8x1xf32>
    %45 = vector.broadcast %44 : vector<8x1xf32> to vector<8x8xf32>
    %46 = arith.subf %42, %45 : vector<8x8xf32>
    %47 = math.exp %46 : vector<8x8xf32>
    %cst_14 = arith.constant dense<0.000000e+00> : vector<8xf32>
    %48 = vector.multi_reduction <add>, %47, %cst_14 [1] : vector<8x8xf32> to vector<8xf32>
    %49 = vector.shape_cast %48 : vector<8xf32> to vector<8x1xf32>
    %50 = tpu.reciprocal %49 : vector<8x1xf32> -> vector<8x1xf32>
    %51 = vector.broadcast %50 : vector<8x1xf32> to vector<8x8xf32>
    %52 = arith.mulf %47, %51 : vector<8x8xf32>
    %53 = vector.shape_cast %52 : vector<8x8xf32> to vector<8x8x1xf32>
    %54 = vector.broadcast %53 : vector<8x8x1xf32> to vector<8x8x32xf32>
    %55 = arith.mulf %54, %38 : vector<8x8x32xf32>
    %cst_15 = arith.constant dense<0.000000e+00> : vector<8x32xf32>
    %56 = vector.multi_reduction <add>, %55, %cst_15 [1] : vector<8x8x32xf32> to vector<8x32xf32>
    %c0_16 = arith.constant 0 : index
    %c0_17 = arith.constant 0 : index
    %57 = vector.load %arg7[%c0_16, %c0_17] : memref<32x32xf32, #tpu.memory_space<vmem>>, vector<32x32xf32>
    %cst_18 = arith.constant dense<0.000000e+00> : vector<8x32xf32>
    %58 = tpu.matmul %56, %57, %cst_18 {dimension_numbers = #tpu.dot_dimension_numbers<[1], [0], [0], [1], [0, 0, 1, 1], [], []>} : vector<8x32xf32>, vector<32x32xf32>, vector<8x32xf32> -> vector<8x32xf32>
    %c0_19 = arith.constant 0 : index
    %c0_20 = arith.constant 0 : index
    %59 = vector.load %arg8[%c0_19, %c0_20] : memref<1x32xf32, #tpu.memory_space<vmem>>, vector<1x32xf32>
    %60 = vector.broadcast %59 : vector<1x32xf32> to vector<8x32xf32>
    %61 = arith.addf %58, %60 : vector<8x32xf32>
    %62 = arith.addf %61, %20 : vector<8x32xf32>
    %c0_21 = arith.constant 0 : index
    %c0_22 = arith.constant 0 : index
    %63 = vector.load %arg9[%c0_21, %c0_22] : memref<8x32xf32, #tpu.memory_space<vmem>>, vector<8x32xf32>
    tpu.vector_store %arg9[%c0_21, %c0_22], %62 {strides = array<i32>} : memref<8x32xf32, #tpu.memory_space<vmem>>, vector<8x32xf32>,
    return
  }
  func.func @transform_0(%arg0: i32) -> (i32, i32) {
    %c0_i32 = arith.constant 0 : i32
    %c0_i32_0 = arith.constant 0 : i32
    return %arg0, %c0_i32 : i32, i32
  }
  func.func @transform_1(%arg0: i32) -> (i32, i32) {
    %c0_i32 = arith.constant 0 : i32
    %c0_i32_0 = arith.constant 0 : i32
    %c0_i32_1 = arith.constant 0 : i32
    return %c0_i32, %c0_i32_0 : i32, i32
  }
  func.func @transform_2(%arg0: i32) -> (i32, i32) {
    %c0_i32 = arith.constant 0 : i32
    %c0_i32_0 = arith.constant 0 : i32
    %c0_i32_1 = arith.constant 0 : i32
    return %c0_i32, %c0_i32_0 : i32, i32
  }
  func.func @transform_3(%arg0: i32) -> (i32, i32) {
    %c0_i32 = arith.constant 0 : i32
    %c0_i32_0 = arith.constant 0 : i32
    %c0_i32_1 = arith.constant 0 : i32
    return %c0_i32, %c0_i32_0 : i32, i32
  }
  func.func @transform_4(%arg0: i32) -> (i32, i32) {
    %c0_i32 = arith.constant 0 : i32
    %c0_i32_0 = arith.constant 0 : i32
    %c0_i32_1 = arith.constant 0 : i32
    return %c0_i32, %c0_i32_0 : i32, i32
  }
  func.func @transform_5(%arg0: i32) -> (i32, i32) {
    %c0_i32 = arith.constant 0 : i32
    %c0_i32_0 = arith.constant 0 : i32
    %c0_i32_1 = arith.constant 0 : i32
    return %c0_i32, %c0_i32_0 : i32, i32
  }
  func.func @transform_6(%arg0: i32) -> (i32, i32) {
    %c0_i32 = arith.constant 0 : i32
    %c0_i32_0 = arith.constant 0 : i32
    %c0_i32_1 = arith.constant 0 : i32
    return %c0_i32, %c0_i32_0 : i32, i32
  }
  func.func @transform_7(%arg0: i32) -> (i32, i32) {
    %c0_i32 = arith.constant 0 : i32
    %c0_i32_0 = arith.constant 0 : i32
    %c0_i32_1 = arith.constant 0 : i32
    return %c0_i32, %c0_i32_0 : i32, i32
  }
  func.func @transform_8(%arg0: i32) -> (i32, i32) {
    %c0_i32 = arith.constant 0 : i32
    %c0_i32_0 = arith.constant 0 : i32
    return %arg0, %c0_i32 : i32, i32
  }
}

</mosaic_0001>

<bundles_post_ra>
// kernel: tpu_custom_call.1
= control target key start
LH: loop header
LB: loop body
LE: loop exit
PB: predicated region body
PF: predicated region fallthrough
CT: control target
= control target key end

     0   :  { %13 = vsyncpa [#allocation3], 0  ;;  %s2664_s0 = inlined_call_operand.vmem [shape: f32[16,3], index: 0, kind: input, shape index: {}]   ;;  %s2665_s1 = inlined_call_operand.vmem [shape: f32[3,256], index: 1, kind: input, shape index: {}]   ;;  %s2666_s2 = inlined_call_operand.hbm [shape: f32[32,288], index: 2, kind: input, shape index: {}]   ;;  %s2667_s3 = inlined_call_operand.vmem [shape: f32[1,288], index: 3, kind: input, shape index: {}]   ;;  %s2668_s4 = inlined_call_operand.hbm [shape: f32[256,512], index: 4, kind: input, shape index: {}]   ;;  %s2669_s5 = inlined_call_operand.vmem [shape: f32[1,512], index: 5, kind: input, shape index: {}]   ;;  %s2670_s6 = inlined_call_operand.hbm [shape: f32[32,32], index: 6, kind: input, shape index: {}]   ;;  %s2671_s7 = inlined_call_operand.vmem [shape: f32[1,32], index: 7, kind: input, shape index: {}]   ;;  %s2672_s8 = inlined_call_operand.hbm [shape: f32[16,32], index: 8, kind: output, shape index: {}]  }
   0x1   :  { %14 = vsyncpa [#allocation6], 0 }
   0x2   :  { %15 = vsyncpa [#allocation4], 0 }
   0x3   :  { %17 = vsyncpa [#allocation4 + $0x1], 0  ;;  %s2271_s27 = smov 0   ;;  %s2273_s28 = smov 0  }
   0x4   :  { %s2275_s29 = smov 0   ;;  %s2277_s30 = smov 0  }
   0x5 LB: > { %s2292_s9 = sadd.s32 4294967295, %s2203_s30   ;;  %s1889_s10 = sadd.s32 4294967294, %s2203_s30   ;;  %s2203_s30 = sphi %s2277_s30, %s2686_s30   ;;  %s2199_s29 = sphi %s2275_s29, %s2685_s29   ;;  %s2195_s28 = sphi %s2273_s28, %s2684_s28   ;;  %s2191_s27 = sphi %s2271_s27, %s2683_s27  }
   0x6   : > { %s2296_s11 = sadd.s32 1, %s2203_s30   ;;  %s203_s12 = sadd.s32 1, %s2199_s29 }
   0x7   : > { %s200_s13 = ssub.s32 %s2203_s30, %s2296_s11  ;;  %p213_p0 = scmp.ne.s32.totalorder %s2199_s29, %s2195_s28 }
   0x8   : > { %p201_p1 = scmp.eq.s32.totalorder %s200_s13, 0  ;;  %p214_p2 = scmp.eq.s32.totalorder %s2292_s9, 1 }
   0x9   : > { %p219_p3 = scmp.ne.s32.totalorder %s2195_s28, %s2191_s27  ;;  %p220_p4 = scmp.eq.s32.totalorder %s1889_s10, 1 }
   0xa   : > { %s2307_s14 = scalar_select %p201_p1, %s2199_s29, %s203_s12  }
   0xb   : > { %p2309_p5 = por %p214_p2, %p213_p0  ;;  %p2313_p6 = por %p220_p4, %p219_p3 }
   0xc   : > { %p1890_p7 = scmp.ge.s32.totalorder %s2203_s30, 1  ;;  %p227_p8 = scmp.lt.s32.totalorder %s2203_s30, 3 }
   0xd   : > { %s2675_s16 = scalar_select %p2313_p6, 1, 0 }
   0xe   : > { %p2673_p9 = scmp.eq.s32.totalorder %s2292_s9, 0  ;;  %p2320_p10 = pnand %p1890_p7, %p227_p8 }
   0xf   : > { %s2205_s18 = smov [#allocation5]   ;;  %s2206_s21 = smov [#allocation2]  }
  0x10   : > { %s258_s19 = sshll.u32 %s2205_s18, 4  ;;  %p1955_p11 = pneg %p2320_p10  ;;  %s259_s19 = int_to_ptr.vmem [resolvable:$true] %s258_s19 }
  0x11   : > { %s242_s22 = sshll.u32 %s2206_s21, 4  ;;  %s2068_s23 = scalar_lea.vmem %s259_s19, 16384  ;;  %s243_s22 = int_to_ptr.vmem [resolvable:$true] %s242_s22 }
  0x12   : > { %p2328_p12 = pnand %p2673_p9, %p1955_p11  ;;  %p2069_p0 = scmp.ne.s32.totalorder %s259_s19, %s2068_s23 }
  0x13   : > { %p2076_p3 = scmp.lt.s32.totalorder %s259_s19, %s259_s19  ;;  %p2077_p4 = scmp.lt.s32.totalorder %s2068_s23, %s2068_s23 }
  0x14   : > { %p2059_p13 = pneg %p2328_p12 }
  0x15   : > { %p2078_p7 = por %p2077_p4, %p2076_p3 }
  0x16   : > { %p2071_p1 = pnand %p2069_p0, %p2059_p13 }
  0x18   : > { %p2072_p2 = pneg %p2071_p1 }
  0x1a   : > { %p2079_p8 = pnand %p2078_p7, %p2072_p2 }
  0x1c   : > { %2082 = shalt.err (!%p2079_p8)
}
  0x1d   : > { %s2207_s24 = smov 512   ;;  %s2208_s25 = smov 32  }
  0x1e   : > { %1961 = dma.hbm_to_vmem [thread:$0]  (!%p2328_p12), %s2668_s4, 16384, %s259_s19, [#allocation6], %s2207_s24, %s2207_s24, %s2208_s25  }
  0x1f   : > { %s2094_s12 = scalar_lea.vmem %s243_s22, 1536  ;;  %p2102_p9 = scmp.lt.s32.totalorder %s243_s22, %s243_s22 }
  0x20   : > { %p2095_p11 = scmp.ne.s32.totalorder %s243_s22, %s2094_s12  ;;  %p2103_p6 = scmp.lt.s32.totalorder %s2094_s12, %s2094_s12 }
  0x22   : > { %p2097_p0 = pnand %p2095_p11, %p2059_p13  ;;  %p2104_p3 = por %p2103_p6, %p2102_p9 }
  0x24   : > { %p2098_p1 = pneg %p2097_p0 }
  0x26   : > { %p2105_p2 = pnand %p2104_p3, %p2098_p1 }
  0x28   : > { %2108 = shalt.err (!%p2105_p2)
}
  0x29   : > { %s2209_s13 = smov 384   ;;  %s2210_s18 = smov 24  }
  0x2a   : > { %1958 = dma.hbm_to_vmem [thread:$0]  (!%p2328_p12), %s2666_s2, 1536, %s243_s22, [#allocation3], %s2209_s13, %s2209_s13, %s2210_s18  }
  0x2b   : > { %s2211_s19 = smov [#allocation7]  }
  0x2c   : > { %s274_s24 = sshll.u32 %s2211_s19, 4  ;;  %s275_s24 = int_to_ptr.vmem [resolvable:$true] %s274_s24 }
  0x2d   : > { %s2120_s25 = scalar_lea.vmem %s275_s24, 512  ;;  %p2128_p9 = scmp.lt.s32.totalorder %s275_s24, %s275_s24 }
  0x2e   : > { %p2121_p4 = scmp.ne.s32.totalorder %s275_s24, %s2120_s25  ;;  %p2129_p8 = scmp.lt.s32.totalorder %s2120_s25, %s2120_s25 }
  0x30   : > { %p2123_p7 = pnand %p2121_p4, %p2059_p13  ;;  %p2130_p11 = por %p2129_p8, %p2128_p9 }
  0x32   : > { %p2124_p6 = pneg %p2123_p7 }
  0x34   : > { %p2131_p0 = pnand %p2130_p11, %p2124_p6 }
  0x36   : > { %2134 = shalt.err (!%p2131_p0)
}
  0x37   : > { %s2212_s26 = smov 128   ;;  %s2213_s10 = smov 8  }
  0x38   : > { %1964 = dma.hbm_to_vmem [thread:$0]  (!%p2328_p12), %s2670_s6, 512, %s275_s24, [#allocation6], %s2212_s26, %s2212_s26, %s2213_s10  }
  0x39   : > { %300 = sbr.rel (%p2320_p10) target bundleno = 1770 (0x6ea), region = 52  ;;  %p2678_p1 = scmp.eq.s32.totalorder (!%p2320_p10), %s2292_s9, 0 }
  0x3e   : > { %2178 = dma.done.wait (%p2678_p1), [#allocation3], 1536   ;;  %p2679_p13 = pmov %p2678_p1 }
  0x3f   : > { %p2680_p3 = pmov %p2678_p1 }
  0x40   : > { %2180 = vsyncadd (%p2679_p13), [#allocation3], 4294965760 }
  0x41   : > { %2182 = dma.done.wait (%p2680_p3), [#allocation6], 16896   ;;  %p2681_p2 = pmov %p2678_p1 }
  0x42   : > { %p341_p4 = scmp.lt.s32.totalorder %s2292_s9, 1  ;;  %v2214_v0 = vmov 0   ;;  %v2215_v1 = vmov 2   ;;  %v2216_v3 = vmov 1   ;;  %v436_v4 = vld [vmem:[#allocation2 + $0x50] sm:$0xff]  ;;  %v435_v5 = vld [vmem:[#allocation2 + $0x48] sm:$0xff]  ;;  %v353_v19 = vlaneseq }
  0x43   : > { %2184 = vsyncadd (%p2681_p2), [#allocation6], 4294950400  ;;  %2028 = vset.pattern.permute.xlu0 %v2214_v0  ;;  %2030 = vset.pattern.permute.xlu1 %v2215_v1  ;;  %v437_v6 = vld [vmem:[#allocation2 + $0x58] sm:$0xff]  ;;  %v2217_v7 = vmov 0.0   ;;  %v432_v9 = vld [vmem:[#allocation2 + $0x30] sm:$0xff]  ;;  %vm2218_vm0 = vmmov 0  }
  0x44   : > { %s342_s17 = scalar_select %p341_p4, %s2292_s9, 1  ;;  %483 = vmatprep.subr.mxu0 %v436_v4  ;;  %1919 = vmatprep.subr.mxu1 %v2217_v7  ;;  %v433_v8 = vld [vmem:[#allocation2 + $0x38] sm:$0xff]  ;;  %v434_v10 = vld [vmem:[#allocation2 + $0x40] sm:$0xff]  ;;  %v431_v13 = vld [vmem:[#allocation2 + $0x28] sm:$0xff]  ;;  %v2381_v20 = vshrl.u32 %v353_v19, 7  ;;  %vm455_vm1 = vcmask 261120  }
  0x45   : > { %484 = vmatpush1.msra.mxu0 %v435_v5  ;;  %1920 = vmatpush3.msra.mxu1 %v437_v6  ;;  %v430_v11 = vld [vmem:[#allocation2 + $0x20] sm:$0xff]  ;;  %v429_v12 = vld [vmem:[#allocation2 + $0x18] sm:$0xff]  ;;  %v427_v14 = vld [vmem:[#allocation2 + $0x8] sm:$0xff]  ;;  %s2219_s12 = smov 32   ;;  %s2220_s22 = smov 96   ;;  %vm1372_vm2 = vcmask 1041409  }
  0x46   : > { %s1900_s20 = sshll.u32 %s342_s17, 3  ;;  %485 = vmatprep.subr.mxu0 %v433_v8  ;;  %1921 = vmatprep.subr.mxu1 %v2217_v7  ;;  %v426_v15 = vld [vmem:[#allocation2] sm:$0xff]  ;;  %v428_v16 = vld [vmem:[#allocation2 + $0x10] sm:$0xff]  ;;  %v665_v17 = vld [vmem:[#allocation5 + $0x1e8] sm:$0xff]  ;;  %v2384_v21 = vsub.s32 4, %v2381_v20  ;;  %v2390_v23 = vsub.s32 0, %v2381_v20 }
  0x47   : > { %s344_s21 = scalar_lea.vmem %s2664_s0, %s1900_s20  ;;  %486 = vmatpush1.msra.mxu0 %v432_v9  ;;  %1922 = vmatpush3.msra.mxu1 %v434_v10  ;;  %v667_v18 = vld [vmem:[#allocation5 + $0x1f8] sm:$0xff]  ;;  %v346_v22 = vld [vmem:[%s2665_s1] sm:$0x77]  ;;  %v2394_v25 = vsub.s32 1, %v2381_v20  ;;  %v2397_v26 = vsub.s32 5, %v2381_v20  ;;  %v2400_v27 = vsub.s32 2, %v2381_v20 }
  0x48   : > { %v345_v2 = vld [vmem:[%s344_s21] sm:$0xff]  ;;  %487 = vmatprep.subr.mxu0 %v430_v11  ;;  %1923 = vmatprep.subr.mxu1 %v2217_v7  ;;  %v360_v24 = vrot.slane %v346_v22, %v2384_v21  ;;  %v2403_v28 = vsub.s32 6, %v2381_v20  ;;  %v356_v29 = vrot.slane %v346_v22, %v2390_v23  ;;  %v666_v54 = vld [vmem:[#allocation5 + $0x1f0] sm:$0xff]  ;;  %v661_v56 = vld [vmem:[#allocation5 + $0x1c8] sm:$0xff]  ;;  %s2221_s17 = smov 64   ;;  %vm1374_vm3 = vcmask 1042434  }
  0x49   : > { %349 = vperm.xlu0 %2028, %v345_v2   ;;  %400 = vperm.xlu1 %2030, %v345_v2   ;;  %v380_v31 = vrot.slane %v346_v22, %v2394_v25  ;;  %v384_v32 = vrot.slane %v346_v22, %v2397_v26  ;;  %v406_v33 = vrot.slane %v346_v22, %v2400_v27  ;;  %v664_v53 = vld [vmem:[#allocation5 + $0x1e0] sm:$0xff]  ;;  %v663_v57 = vld [vmem:[#allocation5 + $0x1d8] sm:$0xff]  ;;  %v662_v59 = vld [vmem:[#allocation5 + $0x1d0] sm:$0xff]  ;;  %vm1376_vm4 = vcmask 1043459   ;;  %s338_s20 = sand.u32 1, %s2195_s28   ;;  %s1906_s23 = sshll.u32 %s2292_s9, 7 }
  0x4a   : > { %488 = vmatpush1.msra.mxu0 %v429_v12  ;;  %1924 = vmatpush3.msra.mxu1 %v431_v13  ;;  %v370_v30 = vrot.slane %v360_v24, %v2390_v23  ;;  %v410_v34 = vrot.slane %v346_v22, %v2403_v28  ;;  %v366_v36 = vrot.slane %v356_v29, %v2390_v23  ;;  %v660_v58 = vld [vmem:[#allocation5 + $0x1c0] sm:$0xff]  ;;  %v657_v60 = vld [vmem:[#allocation5 + $0x1a8] sm:$0xff]  ;;  %v659_v61 = vld [vmem:[#allocation5 + $0x1b8] sm:$0xff]  ;;  %vm1378_vm5 = vcmask 1044484   ;;  %s1899_s13 = sshll.u32 %s338_s20, 3  ;;  %s1797_s10 = scalar_lea.hbm %s2672_s8, %s1906_s23 }
  0x4b   : > { %489 = vmatprep.subr.mxu0 %v427_v14  ;;  %1925 = vmatprep.subr.mxu1 %v2217_v7  ;;  %v390_v38 = vrot.slane %v380_v31, %v2394_v25  ;;  %v394_v39 = vrot.slane %v384_v32, %v2394_v25  ;;  %v416_v40 = vrot.slane %v406_v33, %v2400_v27  ;;  %v656_v62 = vld [vmem:[#allocation5 + $0x1a0] sm:$0xff]  ;;  %v658_v63 = vld [vmem:[#allocation5 + $0x1b0] sm:$0xff]  ;;  %v655_v1 = vld [vmem:[#allocation5 + $0x198] sm:$0xff]  ;;  %vm1380_vm6 = vcmask 1045509   ;;  %s340_s19 = scalar_lea.vmem [#allocation8], %s1899_s13  ;;  %s2225_s9 = smov [#allocation8]  }
  0x4c   : > { %490 = vmatpush1.msra.mxu0 %v426_v15  ;;  %523 = vmatprep.mubr.f32.mxu0 %v2217_v7  ;;  %v420_v41 = vrot.slane %v410_v34, %v2400_v27  ;;  %v649_v4 = vld [vmem:[#allocation5 + $0x168] sm:$0xff]  ;;  %v651_v5 = vld [vmem:[#allocation5 + $0x178] sm:$0xff]  ;;  %v648_v6 = vld [vmem:[#allocation5 + $0x160] sm:$0xff]  ;;  %vm1382_vm7 = vcmask 1046534   ;;  %vm1384_vm8 = vcmask 1047559   ;;  %vm1387_vm9 = vcmask 64512  }
  0x4d   : > { %2029 = vset.pattern.permute.xlu0 %v2216_v3  ;;  %2032 = vset.pattern.permute.xlu1 %v2214_v0  ;;  %v654_v3 = vld [vmem:[#allocation5 + $0x190] sm:$0xff]  ;;  %v645_v9 = vld [vmem:[#allocation5 + $0x148] sm:$0xff]  ;;  %v647_v10 = vld [vmem:[#allocation5 + $0x158] sm:$0xff]  ;;  %s1799_s24 = sshll.u32 %s340_s19, 4  ;;  %s1800_s24 = int_to_ptr.vmem [resolvable:$true] %s1799_s24 }
  0x4e   : > { %374 = vperm.xlu0 %2029, %v345_v2   ;;  %1926 = vmatpush3.msra.mxu1 %v428_v16  ;;  %v652_v2 = vld [vmem:[#allocation5 + $0x180] sm:$0xff]  ;;  %v650_v8 = vld [vmem:[#allocation5 + $0x170] sm:$0xff]  ;;  %v641_v13 = vld [vmem:[#allocation5 + $0x128] sm:$0xff] }
  0x4f   : > { %1927 = vmatprep.mubr.msk.f32.mxu1 %vm2218_vm0, %v2217_v7  ;;  %754 = vmatprep.subr.mxu0 %v665_v17  ;;  %v644_v11 = vld [vmem:[#allocation5 + $0x140] sm:$0xff]  ;;  %v646_v12 = vld [vmem:[#allocation5 + $0x150] sm:$0xff]  ;;  %v643_v14 = vld [vmem:[#allocation5 + $0x138] sm:$0xff] }
  0x50   : > { %825 = vmatprep.subr.mxu1 %v667_v18  ;;  %v640_v15 = vld [vmem:[#allocation5 + $0x120] sm:$0xff]  ;;  %v642_v16 = vld [vmem:[#allocation5 + $0x130] sm:$0xff]  ;;  %v637_v17 = vld [vmem:[#allocation5 + $0x108] sm:$0xff] }
  0x51   : > { %v639_v18 = vld [vmem:[#allocation5 + $0x118] sm:$0xff]  ;;  %v636_v22 = vld [vmem:[#allocation5 + $0x100] sm:$0xff]  ;;  %v638_v24 = vld [vmem:[#allocation5 + $0x110] sm:$0xff] }
  0x52   : > { %2031 = vset.pattern.permute.xlu0 %v2214_v0  ;;  %v653_v0 = vld [vmem:[#allocation5 + $0x188] sm:$0xff]  ;;  %v632_v31 = vld [vmem:[#allocation5 + $0xe0] sm:$0xff]  ;;  %v634_v32 = vld [vmem:[#allocation5 + $0xf0] sm:$0xff] }
  0x53   : > { %v633_v29 = vld [vmem:[#allocation5 + $0xe8] sm:$0xff]  ;;  %v631_v34 = vld [vmem:[#allocation5 + $0xd8] sm:$0xff] }
  0x54   : > { %v629_v33 = vld [vmem:[#allocation5 + $0xc8] sm:$0xff] }
  0xc4   : > { %v350_v35 = vpop.permute.xlu0 %349  ;;  %v401_v42 = vpop.permute.xlu1 %400 }
  0xc5   : > { %v372_v37 = vmul.f32 %v370_v30, %v350_v35  ;;  %v371_v43 = vmul.f32 %v366_v36, %v350_v35  ;;  %v421_v47 = vmul.f32 %v416_v40, %v401_v42  ;;  %v422_v48 = vmul.f32 %v420_v41, %v401_v42  ;;  %v635_v30 = vld [vmem:[#allocation5 + $0xf8] sm:$0xff]  ;;  %v628_v35 = vld [vmem:[#allocation5 + $0xc0] sm:$0xff]  ;;  %v630_v36 = vld [vmem:[#allocation5 + $0xd0] sm:$0xff] }
  0xc6   : > { %v626_v40 = vld [vmem:[#allocation5 + $0xb0] sm:$0xff]  ;;  %v621_v41 = vld [vmem:[#allocation5 + $0x88] sm:$0xff]  ;;  %v623_v42 = vld [vmem:[#allocation5 + $0x98] sm:$0xff] }
  0xc9   : > { %v375_v44 = vpop.permute.xlu0 %374 }
  0xca   : > { %v395_v45 = vmul.f32 %v390_v38, %v375_v44  ;;  %v396_v46 = vmul.f32 %v394_v39, %v375_v44  ;;  %v627_v38 = vld [vmem:[#allocation5 + $0xb8] sm:$0xff]  ;;  %v624_v39 = vld [vmem:[#allocation5 + $0xa0] sm:$0xff]  ;;  %v622_v44 = vld [vmem:[#allocation5 + $0x90] sm:$0xff] }
  0xcc   : > { %v397_v49 = vadd.f32 %v395_v45, %v371_v43  ;;  %v398_v50 = vadd.f32 %v396_v46, %v372_v37  ;;  %v625_v37 = vld [vmem:[#allocation5 + $0xa8] sm:$0xff]  ;;  %v620_v43 = vld [vmem:[#allocation5 + $0x80] sm:$0xff]  ;;  %v619_v46 = vld [vmem:[#allocation5 + $0x78] sm:$0xff] }
  0xcd   : > { %v617_v45 = vld [vmem:[#allocation5 + $0x68] sm:$0xff] }
  0xce   : > { %v2416_v51 = vadd.f32 %v421_v47, %v397_v49  ;;  %v2418_v52 = vadd.f32 %v422_v48, %v398_v50  ;;  %v616_v47 = vld [vmem:[#allocation5 + $0x60] sm:$0xff]  ;;  %v618_v48 = vld [vmem:[#allocation5 + $0x70] sm:$0xff]  ;;  %v613_v49 = vld [vmem:[#allocation5 + $0x48] sm:$0xff] }
  0xcf   : > { %v615_v50 = vld [vmem:[#allocation5 + $0x58] sm:$0xff] }
  0xd0   : > { %2033 = vtanh.f32 %v2416_v51 }
  0xdd   : > { %v2421_v55 = vpop.eup %2033 }
  0xde   : > { %1901 = vmatmul.mubr.msk.f32.vlgmr.msra.gmra.mxu0 %vm455_vm1, %v2421_v55  ;;  %1928 = vmatmul.mubr.msk.f32.vlgmr.msra.gmra.mxu1 %vm455_vm1, %v2421_v55 }
  0xdf   : > { %755 = vmatpush1.msra.mxu0 %v664_v53  ;;  %826 = vmatpush1.msra.mxu1 %v666_v54  ;;  %v612_v53 = vld [vmem:[#allocation5 + $0x40] sm:$0xff]  ;;  %v614_v54 = vld [vmem:[#allocation5 + $0x50] sm:$0xff] }
  0xe0   : > { %756 = vmatprep.subr.mxu0 %v661_v56  ;;  %827 = vmatprep.subr.mxu1 %v663_v57  ;;  %v609_v56 = vld [vmem:[#allocation5 + $0x28] sm:$0xff]  ;;  %v611_v57 = vld [vmem:[#allocation5 + $0x38] sm:$0xff] }
  0xe1   : > { %757 = vmatpush1.msra.mxu0 %v660_v58  ;;  %828 = vmatpush1.msra.mxu1 %v662_v59  ;;  %v608_v58 = vld [vmem:[#allocation5 + $0x20] sm:$0xff]  ;;  %v610_v59 = vld [vmem:[#allocation5 + $0x30] sm:$0xff] }
  0xe2   : > { %758 = vmatprep.subr.mxu0 %v657_v60  ;;  %829 = vmatprep.subr.mxu1 %v659_v61  ;;  %v605_v60 = vld [vmem:[#allocation5 + $0x8] sm:$0xff]  ;;  %v607_v61 = vld [vmem:[#allocation5 + $0x18] sm:$0xff] }
  0xe3   : > { %759 = vmatpush1.msra.mxu0 %v656_v62  ;;  %830 = vmatpush1.msra.mxu1 %v658_v63  ;;  %v604_v62 = vld [vmem:[#allocation5] sm:$0xff]  ;;  %v606_v63 = vld [vmem:[#allocation5 + $0x10] sm:$0xff] }
  0xe4   : > { %760 = vmatprep.subr.mxu0 %v653_v0  ;;  %831 = vmatprep.subr.mxu1 %v655_v1  ;;  %v729_v0 = vld [vmem:[#allocation5 + $0x3e8] sm:$0xff]  ;;  %v731_v1 = vld [vmem:[#allocation5 + $0x3f8] sm:$0xff] }
  0xe5   : > { %761 = vmatpush1.msra.mxu0 %v652_v2  ;;  %832 = vmatpush1.msra.mxu1 %v654_v3  ;;  %v728_v2 = vld [vmem:[#allocation5 + $0x3e0] sm:$0xff]  ;;  %v730_v3 = vld [vmem:[#allocation5 + $0x3f0] sm:$0xff] }
  0xe6   : > { %762 = vmatprep.subr.mxu0 %v649_v4  ;;  %833 = vmatprep.subr.mxu1 %v651_v5  ;;  %v725_v4 = vld [vmem:[#allocation5 + $0x3c8] sm:$0xff]  ;;  %v727_v5 = vld [vmem:[#allocation5 + $0x3d8] sm:$0xff] }
  0xe7   : > { %763 = vmatpush1.msra.mxu0 %v648_v6  ;;  %834 = vmatpush1.msra.mxu1 %v650_v8  ;;  %v724_v6 = vld [vmem:[#allocation5 + $0x3c0] sm:$0xff]  ;;  %v726_v8 = vld [vmem:[#allocation5 + $0x3d0] sm:$0xff] }
  0xe8   : > { %764 = vmatprep.subr.mxu0 %v645_v9  ;;  %835 = vmatprep.subr.mxu1 %v647_v10  ;;  %v721_v9 = vld [vmem:[#allocation5 + $0x3a8] sm:$0xff]  ;;  %v723_v10 = vld [vmem:[#allocation5 + $0x3b8] sm:$0xff] }
  0xe9   : > { %765 = vmatpush1.msra.mxu0 %v644_v11  ;;  %836 = vmatpush1.msra.mxu1 %v646_v12  ;;  %v720_v11 = vld [vmem:[#allocation5 + $0x3a0] sm:$0xff]  ;;  %v722_v12 = vld [vmem:[#allocation5 + $0x3b0] sm:$0xff] }
  0xea   : > { %766 = vmatprep.subr.mxu0 %v641_v13  ;;  %837 = vmatprep.subr.mxu1 %v643_v14  ;;  %v717_v13 = vld [vmem:[#allocation5 + $0x388] sm:$0xff]  ;;  %v719_v14 = vld [vmem:[#allocation5 + $0x398] sm:$0xff] }
  0xeb   : > { %767 = vmatpush1.msra.mxu0 %v640_v15  ;;  %838 = vmatpush1.msra.mxu1 %v642_v16  ;;  %v716_v15 = vld [vmem:[#allocation5 + $0x380] sm:$0xff]  ;;  %v718_v16 = vld [vmem:[#allocation5 + $0x390] sm:$0xff] }
  0xec   : > { %768 = vmatprep.subr.mxu0 %v637_v17  ;;  %839 = vmatprep.subr.mxu1 %v639_v18  ;;  %v713_v17 = vld [vmem:[#allocation5 + $0x368] sm:$0xff]  ;;  %v715_v18 = vld [vmem:[#allocation5 + $0x378] sm:$0xff] }
  0xed   : > { %769 = vmatpush1.msra.mxu0 %v636_v22  ;;  %840 = vmatpush1.msra.mxu1 %v638_v24  ;;  %v712_v22 = vld [vmem:[#allocation5 + $0x360] sm:$0xff]  ;;  %v714_v24 = vld [vmem:[#allocation5 + $0x370] sm:$0xff] }
  0xee   : > { %770 = vmatprep.subr.mxu0 %v633_v29  ;;  %841 = vmatprep.subr.mxu1 %v635_v30  ;;  %v709_v29 = vld [vmem:[#allocation5 + $0x348] sm:$0xff]  ;;  %v711_v30 = vld [vmem:[#allocation5 + $0x358] sm:$0xff] }
  0xef   : > { %771 = vmatpush1.msra.mxu0 %v632_v31  ;;  %842 = vmatpush1.msra.mxu1 %v634_v32  ;;  %v708_v31 = vld [vmem:[#allocation5 + $0x340] sm:$0xff]  ;;  %v710_v32 = vld [vmem:[#allocation5 + $0x350] sm:$0xff] }
  0xf0   : > { %772 = vmatprep.subr.mxu0 %v629_v33  ;;  %843 = vmatprep.subr.mxu1 %v631_v34  ;;  %v705_v33 = vld [vmem:[#allocation5 + $0x328] sm:$0xff]  ;;  %v707_v34 = vld [vmem:[#allocation5 + $0x338] sm:$0xff] }
  0xf1   : > { %773 = vmatpush1.msra.mxu0 %v628_v35  ;;  %844 = vmatpush1.msra.mxu1 %v630_v36  ;;  %v704_v35 = vld [vmem:[#allocation5 + $0x320] sm:$0xff]  ;;  %v706_v36 = vld [vmem:[#allocation5 + $0x330] sm:$0xff] }
  0xf2   : > { %774 = vmatprep.subr.mxu0 %v625_v37  ;;  %845 = vmatprep.subr.mxu1 %v627_v38  ;;  %v701_v37 = vld [vmem:[#allocation5 + $0x308] sm:$0xff]  ;;  %v703_v38 = vld [vmem:[#allocation5 + $0x318] sm:$0xff] }
  0xf3   : > { %775 = vmatpush1.msra.mxu0 %v624_v39  ;;  %846 = vmatpush1.msra.mxu1 %v626_v40  ;;  %v700_v39 = vld [vmem:[#allocation5 + $0x300] sm:$0xff]  ;;  %v702_v40 = vld [vmem:[#allocation5 + $0x310] sm:$0xff] }
  0xf4   : > { %776 = vmatprep.subr.mxu0 %v621_v41  ;;  %847 = vmatprep.subr.mxu1 %v623_v42  ;;  %v697_v41 = vld [vmem:[#allocation5 + $0x2e8] sm:$0xff]  ;;  %v699_v42 = vld [vmem:[#allocation5 + $0x2f8] sm:$0xff] }
  0xf5   : > { %777 = vmatpush1.msra.mxu0 %v620_v43  ;;  %848 = vmatpush1.msra.mxu1 %v622_v44  ;;  %v696_v43 = vld [vmem:[#allocation5 + $0x2e0] sm:$0xff]  ;;  %v698_v44 = vld [vmem:[#allocation5 + $0x2f0] sm:$0xff] }
  0xf6   : > { %778 = vmatprep.subr.mxu0 %v617_v45  ;;  %849 = vmatprep.subr.mxu1 %v619_v46  ;;  %v693_v45 = vld [vmem:[#allocation5 + $0x2c8] sm:$0xff]  ;;  %v695_v46 = vld [vmem:[#allocation5 + $0x2d8] sm:$0xff] }
  0xf7   : > { %779 = vmatpush1.msra.mxu0 %v616_v47  ;;  %850 = vmatpush1.msra.mxu1 %v618_v48  ;;  %v692_v47 = vld [vmem:[#allocation5 + $0x2c0] sm:$0xff]  ;;  %v694_v48 = vld [vmem:[#allocation5 + $0x2d0] sm:$0xff] }
  0xf8   : > { %780 = vmatprep.subr.mxu0 %v613_v49  ;;  %851 = vmatprep.subr.mxu1 %v615_v50  ;;  %v689_v49 = vld [vmem:[#allocation5 + $0x2a8] sm:$0xff]  ;;  %v691_v50 = vld [vmem:[#allocation5 + $0x2b8] sm:$0xff] }
  0xf9   : > { %781 = vmatpush1.msra.mxu0 %v612_v53  ;;  %852 = vmatpush1.msra.mxu1 %v614_v54  ;;  %v688_v53 = vld [vmem:[#allocation5 + $0x2a0] sm:$0xff]  ;;  %v690_v54 = vld [vmem:[#allocation5 + $0x2b0] sm:$0xff] }
  0xfa   : > { %782 = vmatprep.subr.mxu0 %v609_v56  ;;  %853 = vmatprep.subr.mxu1 %v611_v57  ;;  %v685_v56 = vld [vmem:[#allocation5 + $0x288] sm:$0xff]  ;;  %v687_v57 = vld [vmem:[#allocation5 + $0x298] sm:$0xff] }
  0xfb   : > { %783 = vmatpush1.msra.mxu0 %v608_v58  ;;  %854 = vmatpush1.msra.mxu1 %v610_v59  ;;  %v684_v58 = vld [vmem:[#allocation5 + $0x280] sm:$0xff]  ;;  %v686_v59 = vld [vmem:[#allocation5 + $0x290] sm:$0xff] }
  0xfc   : > { %784 = vmatprep.subr.mxu0 %v605_v60  ;;  %855 = vmatprep.subr.mxu1 %v607_v61  ;;  %v681_v60 = vld [vmem:[#allocation5 + $0x268] sm:$0xff]  ;;  %v683_v61 = vld [vmem:[#allocation5 + $0x278] sm:$0xff] }
  0xfd   : > { %785 = vmatpush1.msra.mxu0 %v604_v62  ;;  %856 = vmatpush1.msra.mxu1 %v606_v63  ;;  %v680_v62 = vld [vmem:[#allocation5 + $0x260] sm:$0xff]  ;;  %v682_v63 = vld [vmem:[#allocation5 + $0x270] sm:$0xff] }
  0xfe   : > { %786 = vmatprep.subr.mxu0 %v729_v0  ;;  %857 = vmatprep.subr.mxu1 %v731_v1  ;;  %v677_v0 = vld [vmem:[#allocation5 + $0x248] sm:$0xff]  ;;  %v679_v1 = vld [vmem:[#allocation5 + $0x258] sm:$0xff] }
  0xff   : > { %787 = vmatpush2.msra.mxu0 %v728_v2  ;;  %858 = vmatpush2.msra.mxu1 %v730_v3  ;;  %v676_v2 = vld [vmem:[#allocation5 + $0x240] sm:$0xff]  ;;  %v678_v3 = vld [vmem:[#allocation5 + $0x250] sm:$0xff] }
 0x100   : > { %788 = vmatprep.subr.mxu0 %v725_v4  ;;  %859 = vmatprep.subr.mxu1 %v727_v5  ;;  %v673_v4 = vld [vmem:[#allocation5 + $0x228] sm:$0xff]  ;;  %v675_v5 = vld [vmem:[#allocation5 + $0x238] sm:$0xff] }
 0x101   : > { %789 = vmatpush2.msra.mxu0 %v724_v6  ;;  %860 = vmatpush2.msra.mxu1 %v726_v8  ;;  %v672_v6 = vld [vmem:[#allocation5 + $0x220] sm:$0xff]  ;;  %v674_v8 = vld [vmem:[#allocation5 + $0x230] sm:$0xff] }
 0x102   : > { %790 = vmatprep.subr.mxu0 %v721_v9  ;;  %861 = vmatprep.subr.mxu1 %v723_v10  ;;  %v669_v9 = vld [vmem:[#allocation5 + $0x208] sm:$0xff]  ;;  %v671_v10 = vld [vmem:[#allocation5 + $0x218] sm:$0xff] }
 0x103   : > { %791 = vmatpush2.msra.mxu0 %v720_v11  ;;  %862 = vmatpush2.msra.mxu1 %v722_v12  ;;  %v668_v11 = vld [vmem:[#allocation5 + $0x200] sm:$0xff]  ;;  %v670_v12 = vld [vmem:[#allocation5 + $0x210] sm:$0xff] }
 0x104   : > { %792 = vmatprep.subr.mxu0 %v717_v13  ;;  %863 = vmatprep.subr.mxu1 %v719_v14  ;;  %v438_v13 = vld [vmem:[%s2667_s3] sm:$0x7] }
 0x105   : > { %793 = vmatpush2.msra.mxu0 %v716_v15  ;;  %864 = vmatpush2.msra.mxu1 %v718_v16  ;;  %v443_v14 = vrot.slane %v438_v13, %v2390_v23  ;;  %v447_v15 = vrot.slane %v438_v13, %v2394_v25 }
 0x106   : > { %794 = vmatprep.subr.mxu0 %v713_v17  ;;  %865 = vmatprep.subr.mxu1 %v715_v18 }
 0x107   : > { %795 = vmatpush2.msra.mxu0 %v712_v22  ;;  %866 = vmatpush2.msra.mxu1 %v714_v24 }
 0x108   : > { %796 = vmatprep.subr.mxu0 %v709_v29  ;;  %867 = vmatprep.subr.mxu1 %v711_v30 }
 0x109   : > { %797 = vmatpush2.msra.mxu0 %v708_v31  ;;  %868 = vmatpush2.msra.mxu1 %v710_v32 }
 0x10a   : > { %798 = vmatprep.subr.mxu0 %v705_v33  ;;  %869 = vmatprep.subr.mxu1 %v707_v34  ;;  %v2440_v34 = vld [vmem:[%s2669_s5] sm:$0xf] }
 0x10b   : > { %799 = vmatpush2.msra.mxu0 %v704_v35  ;;  %870 = vmatpush2.msra.mxu1 %v706_v36  ;;  %v741_v36 = vrot.slane %v2440_v34, %v2394_v25 }
 0x10c   : > { %800 = vmatprep.subr.mxu0 %v701_v37  ;;  %871 = vmatprep.subr.mxu1 %v703_v38 }
 0x10d   : > { %801 = vmatpush2.msra.mxu0 %v700_v39  ;;  %872 = vmatpush2.msra.mxu1 %v702_v40  ;;  %v2222_v39 = vmov 1966171168  }
 0x10e   : > { %802 = vmatprep.subr.mxu0 %v697_v41  ;;  %873 = vmatprep.subr.mxu1 %v699_v42  ;;  %v1211_v40 = vunpack.c.l.s4 %v2222_v39  ;;  %v451_v41 = vrot.slane %v438_v13, %v2400_v27 }
 0x10f   : > { %803 = vmatpush2.msra.mxu0 %v696_v43  ;;  %874 = vmatpush2.msra.mxu1 %v698_v44  ;;  %v2223_v43 = vmov 1983009808  }
 0x110   : > { %804 = vmatprep.subr.mxu0 %v693_v45  ;;  %875 = vmatprep.subr.mxu1 %v695_v46  ;;  %v1212_v42 = vunpack.c.0.s8 %v1211_v40  ;;  %v919_v44 = vunpack.c.l.s4 %v2223_v43 }
 0x111   : > { %805 = vmatpush2.msra.mxu0 %v692_v47  ;;  %876 = vmatpush2.msra.mxu1 %v694_v48 }
 0x112   : > { %806 = vmatprep.subr.mxu0 %v689_v49  ;;  %877 = vmatprep.subr.mxu1 %v691_v50  ;;  %v2454_v48 = vsub.s32 %v1212_v42, %v2381_v20  ;;  %v920_v49 = vunpack.c.0.s8 %v919_v44 }
 0x113   : > { %807 = vmatpush2.msra.mxu0 %v688_v53  ;;  %878 = vmatpush2.msra.mxu1 %v690_v54 }
 0x114   : > { %808 = vmatprep.subr.mxu0 %v685_v56  ;;  %879 = vmatprep.subr.mxu1 %v687_v57  ;;  %v2224_v56 = vmov 1934713408  }
 0x115   : > { %809 = vmatpush2.msra.mxu0 %v684_v58  ;;  %880 = vmatpush2.msra.mxu1 %v686_v59  ;;  %v983_v57 = vunpack.c.l.s4 %v2224_v56 }
 0x116   : > { %810 = vmatprep.subr.mxu0 %v681_v60  ;;  %881 = vmatprep.subr.mxu1 %v683_v61  ;;  %v2458_v61 = vsub.s32 %v920_v49, %v2381_v20 }
 0x117   : > { %811 = vmatpush2.msra.mxu0 %v680_v62  ;;  %882 = vmatpush2.msra.mxu1 %v682_v63 }
 0x118   : > { %812 = vmatprep.subr.mxu0 %v677_v0  ;;  %883 = vmatprep.subr.mxu1 %v679_v1 }
 0x119   : > { %813 = vmatpush2.msra.mxu0 %v676_v2  ;;  %884 = vmatpush2.msra.mxu1 %v678_v3 }
 0x11a   : > { %814 = vmatprep.subr.mxu0 %v673_v4  ;;  %885 = vmatprep.subr.mxu1 %v675_v5  ;;  %v984_v4 = vunpack.c.0.s8 %v983_v57 }
 0x11b   : > { %815 = vmatpush2.msra.mxu0 %v672_v6  ;;  %886 = vmatpush2.msra.mxu1 %v674_v8 }
 0x11c   : > { %816 = vmatprep.subr.mxu0 %v669_v9  ;;  %887 = vmatprep.subr.mxu1 %v671_v10 }
 0x11d   : > { %817 = vmatpush2.msra.mxu0 %v668_v11  ;;  %888 = vmatpush2.msra.mxu1 %v670_v12 }
 0x11e   : > { %1930 = vmatprep.subr.mxu0 %v2217_v7 }
 0x19e   : > { %v525_v16 = vpop.f32.mrf.mxu0  ;;  %v596_v17 = vpop.f32.mrf.mxu1 }
 0x19f   : > { %v526_v18 = vadd.f32 %v525_v16, %v443_v14  ;;  %v597_v47 = vadd.f32 %v596_v17, %v451_v41 }
 0x1a0   : > { %v527_v22 = vpop.f32.mrf.mxu0  ;;  %v1929_v24 = vpop.f32.mrf.mxu1 }
 0x1a1   : > { %v528_v29 = vadd.f32 %v527_v22, %v447_v15  ;;  %v600_v30 = vadd.f32 %v526_v18, %v2416_v51  ;;  %v737_v51 = vrot.slane %v2440_v34, %v2390_v23  ;;  %v1209_v58 = vcombine.high %v597_v47, %v597_v47 }
 0x1a2   : > { %v1216_v60 = vrot.slane %v597_v47, %v2454_v48  ;;  %v2468_v18 = vsub.s32 %v984_v4, %v2381_v20 }
 0x1a3   : > { %v601_v31 = vadd.f32 %v528_v29, %v2418_v52  ;;  %v1223_v6 = vrot.slane %v1209_v58, %v2454_v48 }
 0x1a4   : > { %v1224_v8 = vcombine.high %v1216_v60, %v1216_v60  ;;  %v1232_v12 = vrot.slane %v1216_v60, %v2454_v48 }
 0x1a5   : > { %2035 = vtanh.f32 %v601_v31 }
 0x1a6   : > { %2037 = vtanh.f32 %v600_v30  ;;  %v1246_v31 = vrot.slane %v1224_v8, %v2454_v48  ;;  %v1254_v39 = vcombine.high %v1232_v12, %v1232_v12 }
 0x1a8   : > { %v1265_v44 = vrot.slane %v1246_v31, %v2390_v23 }
 0x1b2   : > { %v2036_v32 = vpop.eup %2035 }
 0x1b3   : > { %v2038_v33 = vpop.eup %2037  ;;  %818 = vmatprep.mubr.f32.mxu0 %v2036_v32  ;;  %889 = vmatprep.mubr.f32.mxu1 %v2036_v32  ;;  %v1239_v32 = vrot.slane %v1223_v6, %v2454_v48 }
 0x1b4   : > { %819 = vmatmul.mubr.f32.vlgmr.msra.gmra.mxu0 %v2038_v33  ;;  %890 = vmatmul.mubr.f32.vlgmr.msra.gmra.mxu1 %v2038_v33 }
 0x1b5   : > { %1938 = vmatprep.mubr.msk.f32.mxu0 %vm2218_vm0, %v2217_v7  ;;  %v1277_v56 = vrot.slane %v1239_v32, %v2390_v23  ;;  %v1255_v58 = vcombine.high %v1239_v32, %v1239_v32 }
 0x274   : > { %v820_v52 = vpop.f32.mrf.mxu0 }
 0x275   : > { %v821_v35 = vadd.f32 %v820_v52, %v737_v51 }
 0x276   : > { %v822_v37 = vpop.f32.mrf.mxu0 }
 0x277   : > { %903 = vrot.lane.b32.xlu0 %v821_v35, %s2219_s12  ;;  %897 = vrot.lane.b32.xlu1 %v821_v35, %s2220_s22  ;;  %v823_v38 = vadd.f32 %v822_v37, %v741_v36 }
 0x27b   : > { %910 = vrot.lane.b32.xlu0 %v823_v38, %s2221_s17  ;;  %900 = vrot.lane.b32.xlu1 %v821_v35, %s2221_s17 }
 0x27f   : > { %907 = vrot.lane.b32.xlu1 %v823_v38, %s2220_s22 }
 0x283   : > { %913 = vrot.lane.b32.xlu1 %v823_v38, %s2219_s12 }
 0x2e9   : > { %v898_v45 = vpop.permute.xlu1 %897  ;;  %v904_v46 = vpop.permute.xlu0 %903 }
 0x2ea   : > { %v932_v62 = vcombine.low %v898_v45, %v904_v46  ;;  %v933_v63 = vcombine.high %v898_v45, %v904_v46  ;;  %v1261_v45 = vrot.slane %v1232_v12, %v2390_v23 }
 0x2ec   : > { %v940_v9 = vrot.slane %v932_v62, %v2458_v61  ;;  %v947_v10 = vrot.slane %v933_v63, %v2458_v61  ;;  %v1269_v62 = vrot.slane %v1254_v39, %v2390_v23  ;;  %v1256_v63 = vcombine.high %v1246_v31, %v1246_v31 }
 0x2ed   : > { %v901_v50 = vpop.permute.xlu1 %900  ;;  %v911_v59 = vpop.permute.xlu0 %910 }
 0x2ee   : > { %v916_v53 = vcombine.low %v821_v35, %v901_v50  ;;  %v917_v54 = vcombine.high %v821_v35, %v901_v50  ;;  %v948_v1 = vcombine.low %v823_v38, %v911_v59  ;;  %v949_v5 = vcombine.high %v823_v38, %v911_v59 }
 0x2ef   : > { %v1273_v8 = vrot.slane %v1256_v63, %v2390_v23 }
 0x2f0   : > { %v924_v2 = vrot.slane %v916_v53, %v2458_v61  ;;  %v931_v3 = vrot.slane %v917_v54, %v2458_v61  ;;  %v956_v15 = vrot.slane %v948_v1, %v2458_v61  ;;  %v963_v22 = vrot.slane %v949_v5, %v2458_v61 }
 0x2f1   : > { %v908_v0 = vpop.permute.xlu1 %907  ;;  %v1225_v54 = vcombine.high %v1223_v6, %v1223_v6  ;;  %v1285_v6 = vrot.slane %v1255_v58, %v2390_v23 }
 0x2f2   : > { %v980_v16 = vcombine.low %v924_v2, %v940_v9  ;;  %v996_v17 = vcombine.low %v931_v3, %v947_v10  ;;  %v981_v24 = vcombine.high %v924_v2, %v940_v9  ;;  %v997_v36 = vcombine.high %v931_v3, %v947_v10 }
 0x2f3   : > { %v1253_v9 = vrot.slane %v1225_v54, %v2454_v48 }
 0x2f4   : > { %v988_v37 = vrot.slane %v980_v16, %v2468_v18  ;;  %v1004_v38 = vrot.slane %v996_v17, %v2468_v18  ;;  %v995_v42 = vrot.slane %v981_v24, %v2468_v18  ;;  %v1011_v57 = vrot.slane %v997_v36, %v2468_v18 }
 0x2f5   : > { %v914_v11 = vpop.permute.xlu1 %913  ;;  %v1257_v16 = vcombine.high %v1253_v9, %v1253_v9 }
 0x2f6   : > { %v964_v13 = vcombine.low %v908_v0, %v914_v11  ;;  %v965_v14 = vcombine.high %v908_v0, %v914_v11 }
 0x2f7   : > { %v1289_v48 = vrot.slane %v1257_v16, %v2390_v23  ;;  %v1422_v16 = vsub.s32 7, %v2381_v20 }
 0x2f8   : > { %v972_v29 = vrot.slane %v964_v13, %v2458_v61  ;;  %v979_v30 = vrot.slane %v965_v14, %v2458_v61 }
 0x2fa   : > { %v1012_v33 = vcombine.low %v956_v15, %v972_v29  ;;  %v1013_v51 = vcombine.high %v956_v15, %v972_v29  ;;  %v1028_v52 = vcombine.low %v963_v22, %v979_v30  ;;  %v1029_v35 = vcombine.high %v963_v22, %v979_v30 }
 0x2fb   : > { %v1281_v15 = vrot.slane %v1253_v9, %v2390_v23 }
 0x2fc   : > { %v1020_v40 = vrot.slane %v1012_v33, %v2468_v18  ;;  %v1036_v41 = vrot.slane %v1028_v52, %v2468_v18  ;;  %v1027_v43 = vrot.slane %v1013_v51, %v2468_v18  ;;  %v1043_v46 = vrot.slane %v1029_v35, %v2468_v18 }
 0x2fd   : > { %v1339_v33 = vand.u32 127, %v353_v19 }
 0x2fe   : > { %v1045_v47 = vcombine.high %v988_v37, %v1020_v40  ;;  %v1044_v49 = vcombine.low %v988_v37, %v1020_v40  ;;  %v1048_v50 = vcombine.low %v1004_v38, %v1036_v41  ;;  %v1046_v53 = vcombine.low %v995_v42, %v1027_v43 }
 0x2ff   : > { %v1050_v0 = vcombine.low %v1011_v57, %v1043_v46  ;;  %v1047_v1 = vcombine.high %v995_v42, %v1027_v43  ;;  %v1049_v10 = vcombine.high %v1004_v38, %v1036_v41  ;;  %v1051_v29 = vcombine.high %v1011_v57, %v1043_v46 }
 0x300   : > { %v1299_v59 = vmul.f32 %v1265_v44, %v1045_v47  ;;  %v1298_v60 = vmul.f32 %v1261_v45, %v1044_v49  ;;  %v1302_v4 = vmul.f32 %v1277_v56, %v1048_v50  ;;  %v1300_v5 = vmul.f32 %v1269_v62, %v1046_v53 }
 0x301   : > { %v1304_v13 = vmul.f32 %v1285_v6, %v1050_v0  ;;  %v1301_v14 = vmul.f32 %v1273_v8, %v1047_v1  ;;  %v1303_v24 = vmul.f32 %v1281_v15, %v1049_v10  ;;  %v1305_v31 = vmul.f32 %v1289_v48, %v1051_v29 }
 0x302   : > { %v1309_v2 = vsel %vm455_vm1, %v1299_v59, 0.0  ;;  %v1306_v3 = vsel %vm455_vm1, %v1298_v60, 0.0  ;;  %v1318_v11 = vsel %vm455_vm1, %v1302_v4, 0.0  ;;  %v1312_v12 = vsel %vm455_vm1, %v1300_v5, 0.0 }
 0x303   : > { %1310 = vadd.xlane.f32.xlu1 %v1309_v2  ;;  %1307 = vadd.xlane.f32.xlu0 %v1306_v3  ;;  %v1324_v17 = vsel %vm455_vm1, %v1304_v13, 0.0  ;;  %v1315_v22 = vsel %vm455_vm1, %v1301_v14, 0.0  ;;  %v1321_v30 = vsel %vm455_vm1, %v1303_v24, 0.0  ;;  %v1327_v32 = vsel %vm455_vm1, %v1305_v31, 0.0 }
 0x304   : > { %v2502_v52 = vsub.s32 %v1339_v33, %v2381_v20  ;;  %v2524_v2 = vsub.s32 3, %v2381_v20  ;;  %v745_v29 = vrot.slane %v2440_v34, %v2400_v27 }
 0x307   : > { %1319 = vadd.xlane.f32.xlu1 %v1318_v11  ;;  %1313 = vadd.xlane.f32.xlu0 %v1312_v12 }
 0x30b   : > { %1325 = vadd.xlane.f32.xlu1 %v1324_v17  ;;  %1316 = vadd.xlane.f32.xlu0 %v1315_v22 }
 0x30f   : > { %1322 = vadd.xlane.f32.xlu0 %v1321_v30  ;;  %v891_v30 = vpop.f32.mrf.mxu1 }
 0x313   : > { %1328 = vadd.xlane.f32.xlu0 %v1327_v32 }
 0x38c   : > { %v1308_v51 = vpop.xlane.xlu0 %1307  ;;  %v1311_v35 = vpop.xlane.xlu1 %1310 }
 0x38d   : > { %v1347_v37 = vrot.slane %v1311_v35, %v2502_v52  ;;  %v1343_v38 = vrot.slane %v1308_v51, %v2502_v52 }
 0x38f   : > { %v1373_v42 = vsel %vm1372_vm2, %v1347_v37, %v1343_v38 }
 0x390   : > { %v1314_v36 = vpop.xlane.xlu0 %1313  ;;  %v1320_v40 = vpop.xlane.xlu1 %1319 }
 0x391   : > { %v1351_v39 = vrot.slane %v1314_v36, %v2502_v52  ;;  %v1359_v45 = vrot.slane %v1320_v40, %v2502_v52 }
 0x393   : > { %v1375_v43 = vsel %vm1374_vm3, %v1351_v39, %v1373_v42  ;;  %v893_v42 = vpop.f32.mrf.mxu1 }
 0x394   : > { %v1317_v41 = vpop.xlane.xlu0 %1316  ;;  %v1326_v47 = vpop.xlane.xlu1 %1325 }
 0x395   : > { %v1355_v19 = vrot.slane %v1317_v41, %v2502_v52  ;;  %v1367_v54 = vrot.slane %v1326_v47, %v2502_v52 }
 0x397   : > { %v1377_v44 = vsel %vm1376_vm4, %v1355_v19, %v1375_v43 }
 0x398   : > { %v1323_v46 = vpop.xlane.xlu0 %1322  ;;  %v1379_v50 = vsel %vm1378_vm5, %v1359_v45, %v1377_v44 }
 0x399   : > { %v1363_v49 = vrot.slane %v1323_v46, %v2502_v52 }
 0x39b   : > { %v1381_v53 = vsel %vm1380_vm6, %v1363_v49, %v1379_v50 }
 0x39c   : > { %v1329_v56 = vpop.xlane.xlu0 %1328  ;;  %v1383_v58 = vsel %vm1382_vm7, %v1367_v54, %v1381_v53 }
 0x39d   : > { %v1371_v57 = vrot.slane %v1329_v56, %v2502_v52 }
 0x39f   : > { %v1385_v59 = vsel %vm1384_vm8, %v1371_v57, %v1383_v58 }
 0x3a0   : > { %v1388_v60 = vsel %vm1387_vm9, %v1385_v59, -inf }
 0x3a1   : > { %1389 = vmax.xlane.f32.xlu1 %v1388_v60 }
 0x42a   : > { %v1390_v62 = vpop.xlane.xlu1 %1389 }
 0x42b   : > { %v1395_v63 = vrot.slane %v1390_v62, %v2390_v23  ;;  %v1399_v0 = vrot.slane %v1390_v62, %v2394_v25  ;;  %v1403_v1 = vrot.slane %v1390_v62, %v2400_v27  ;;  %v1407_v5 = vrot.slane %v1390_v62, %v2524_v2 }
 0x42c   : > { %v1411_v10 = vrot.slane %v1390_v62, %v2384_v21  ;;  %v1415_v13 = vrot.slane %v1390_v62, %v2397_v26  ;;  %v1419_v17 = vrot.slane %v1390_v62, %v2403_v28  ;;  %v1423_v31 = vrot.slane %v1390_v62, %v1422_v16 }
 0x42d   : > { %v1432_v3 = vsub.f32 %v1308_v51, %v1395_v63  ;;  %v1433_v4 = vsub.f32 %v1311_v35, %v1399_v0  ;;  %v1434_v6 = vsub.f32 %v1314_v36, %v1403_v1  ;;  %v1435_v11 = vsub.f32 %v1317_v41, %v1407_v5 }
 0x42e   : > { %v1436_v14 = vsub.f32 %v1320_v40, %v1411_v10  ;;  %v1437_v22 = vsub.f32 %v1323_v46, %v1415_v13  ;;  %v1438_v32 = vsub.f32 %v1326_v47, %v1419_v17  ;;  %v2541_v35 = vadd.f32 %v891_v30, %v745_v29 }
 0x42f   : > { %v1440_v8 = vmul.f32 1.442695, %v1432_v3  ;;  %v1442_v9 = vmul.f32 1.442695, %v1433_v4  ;;  %v1444_v12 = vmul.f32 1.442695, %v1434_v6  ;;  %v1439_v36 = vsub.f32 %v1329_v56, %v1423_v31 }
 0x430   : > { %v1446_v15 = vmul.f32 1.442695, %v1435_v11  ;;  %v1448_v24 = vmul.f32 1.442695, %v1436_v14  ;;  %v1450_v33 = vmul.f32 1.442695, %v1437_v22  ;;  %v749_v41 = vrot.slane %v2440_v34, %v2524_v2 }
 0x431   : > { %2039 = vpow2.f32 %v1440_v8  ;;  %v1452_v37 = vmul.f32 1.442695, %v1438_v32  ;;  %v1454_v39 = vmul.f32 1.442695, %v1439_v36 }
 0x432   : > { %2041 = vpow2.f32 %v1442_v9  ;;  %v2551_v43 = vadd.f32 %v893_v42, %v749_v41 }
 0x433   : > { %2043 = vpow2.f32 %v1444_v12 }
 0x434   : > { %2045 = vpow2.f32 %v1446_v15 }
 0x435   : > { %2047 = vpow2.f32 %v1448_v24 }
 0x436   : > { %2049 = vpow2.f32 %v1450_v33 }
 0x437   : > { %2051 = vpow2.f32 %v1452_v37  ;;  %v1687_v37 = vld [vmem:[#allocation7 + $0x10] sm:$0xff] }
 0x438   : > { %2053 = vpow2.f32 %v1454_v39 }
 0x43e   : > { %v2533_v48 = vpop.eup %2039 }
 0x43f   : > { %v2537_v51 = vpop.eup %2041  ;;  %1465 = vperm.xlu0 %2031, %v2533_v48  }
 0x440   : > { %1468 = vperm.xlu1 %2032, %v2537_v51   ;;  %v2044_v38 = vpop.eup %2043 }
 0x441   : > { %v2046_v40 = vpop.eup %2045 }
 0x442   : > { %v2048_v19 = vpop.eup %2047 }
 0x443   : > { %1053 = vrot.lane.b32.xlu0 %v2541_v35, %s2220_s22  ;;  %v2050_v44 = vpop.eup %2049 }
 0x444   : > { %1471 = vperm.xlu1 %2032, %v2044_v38   ;;  %v2052_v45 = vpop.eup %2051 }
 0x445   : > { %v2054_v34 = vpop.eup %2053 }
 0x447   : > { %1056 = vrot.lane.b32.xlu0 %v2541_v35, %s2221_s17 }
 0x448   : > { %1474 = vperm.xlu1 %2032, %v2046_v40  }
 0x44b   : > { %1059 = vrot.lane.b32.xlu0 %v2541_v35, %s2219_s12 }
 0x44c   : > { %1477 = vperm.xlu1 %2032, %v2048_v19  }
 0x44f   : > { %1063 = vrot.lane.b32.xlu0 %v2551_v43, %s2220_s22  ;;  %s2135_s22 = scalar_lea.vmem %s1800_s24, 128 }
 0x450   : > { %1480 = vperm.xlu1 %2032, %v2050_v44   ;;  %p2136_p10 = scmp.ne.s32.totalorder %s1800_s24, %s2135_s22 }
 0x452   : > { %p2137_p12 = pnand %p2136_p10, %p2309_p5 }
 0x453   : > { %1066 = vrot.lane.b32.xlu0 %v2551_v43, %s2221_s17  ;;  %s2139_s17 = sshll.u32 %s2225_s9, 4  ;;  %s2140_s17 = int_to_ptr.vmem [resolvable:$false] %s2139_s17 }
 0x454   : > { %1483 = vperm.xlu1 %2032, %v2052_v45   ;;  %p2138_p7 = pneg %p2137_p12  ;;  %s2141_s13 = scalar_lea.vmem %s2140_s17, 256 }
 0x455   : > { %p2142_p6 = scmp.lt.s32.totalorder %s1800_s24, %s2140_s17  ;;  %p2143_p9 = scmp.lt.s32.totalorder %s2141_s13, %s2135_s22 }
 0x457   : > { %1069 = vrot.lane.b32.xlu0 %v2551_v43, %s2219_s12  ;;  %s1786_s12 = scalar_lea.sflag [#allocation4], %s338_s20  ;;  %p2144_p8 = por %p2143_p9, %p2142_p6 }
 0x458   : > { %1486 = vperm.xlu1 %2032, %v2054_v34  }
 0x459   : > { %p2145_p11 = pnand %p2144_p8, %p2138_p7 }
 0x4ba   : > { %v1466_v53 = vpop.permute.xlu0 %1465 }
 0x4bb   : > { %v1469_v46 = vpop.permute.xlu1 %1468  ;;  %v1491_v57 = vrot.slane %v1466_v53, %v2502_v52 }
 0x4bc   : > { %v1495_v56 = vrot.slane %v1469_v46, %v2502_v52 }
 0x4be   : > { %v1520_v63 = vsel %vm1372_vm2, %v1495_v56, %v1491_v57 }
 0x4bf   : > { %v1472_v47 = vpop.permute.xlu1 %1471 }
 0x4c0   : > { %v1499_v58 = vrot.slane %v1472_v47, %v2502_v52 }
 0x4c2   : > { %v1521_v1 = vsel %vm1374_vm3, %v1499_v58, %v1520_v63 }
 0x4c3   : > { %v1475_v49 = vpop.permute.xlu1 %1474 }
 0x4c4   : > { %v1503_v59 = vrot.slane %v1475_v49, %v2502_v52 }
 0x4c6   : > { %v1522_v4 = vsel %vm1376_vm4, %v1503_v59, %v1521_v1 }
 0x4c7   : > { %v1478_v50 = vpop.permute.xlu1 %1477 }
 0x4c8   : > { %v1507_v60 = vrot.slane %v1478_v50, %v2502_v52 }
 0x4ca   : > { %v1523_v5 = vsel %vm1378_vm5, %v1507_v60, %v1522_v4 }
 0x4cb   : > { %v1481_v54 = vpop.permute.xlu1 %1480 }
 0x4cc   : > { %v1511_v0 = vrot.slane %v1481_v54, %v2502_v52 }
 0x4ce   : > { %v1524_v8 = vsel %vm1380_vm6, %v1511_v0, %v1523_v5 }
 0x4cf   : > { %v1484_v62 = vpop.permute.xlu1 %1483 }
 0x4d0   : > { %v1515_v3 = vrot.slane %v1484_v62, %v2502_v52 }
 0x4d2   : > { %v1525_v10 = vsel %vm1382_vm7, %v1515_v3, %v1524_v8 }
 0x4d3   : > { %v1487_v6 = vpop.permute.xlu1 %1486 }
 0x4d4   : > { %v1519_v9 = vrot.slane %v1487_v6, %v2502_v52 }
 0x4d6   : > { %v1526_v11 = vsel %vm1384_vm8, %v1519_v9, %v1525_v10 }
 0x4d7   : > { %v1528_v12 = vsel %vm1387_vm9, %v1526_v11, 0.0 }
 0x4d8   : > { %1529 = vadd.xlane.f32.xlu1 %v1528_v12 }
 0x561   : > { %v1530_v13 = vpop.xlane.xlu1 %1529 }
 0x562   : > { %2055 = vrcp.f32 %v1530_v13 }
 0x56f   : > { %v2056_v14 = vpop.eup %2055 }
 0x570   : > { %v1548_v15 = vrot.slane %v2056_v14, %v2524_v2  ;;  %v1536_v17 = vrot.slane %v2056_v14, %v2390_v23  ;;  %v1540_v29 = vrot.slane %v2056_v14, %v2394_v25  ;;  %v1544_v30 = vrot.slane %v2056_v14, %v2400_v27  ;;  %v1688_v27 = vld [vmem:[#allocation7 + $0x18] sm:$0xff] }
 0x571   : > { %v1552_v32 = vrot.slane %v2056_v14, %v2384_v21  ;;  %v1556_v2 = vrot.slane %v2056_v14, %v2397_v26  ;;  %v1564_v36 = vrot.slane %v2056_v14, %v1422_v16  ;;  %1931 = vmatpush3.msra.mxu0 %v1688_v27  ;;  %v1686_v21 = vld [vmem:[#allocation7 + $0x8] sm:$0xff]  ;;  %v1685_v26 = vld [vmem:[#allocation7] sm:$0xff] }
 0x572   : > { %v1576_v22 = vmul.f32 %v2046_v40, %v1548_v15  ;;  %v1573_v24 = vmul.f32 %v2533_v48, %v1536_v17  ;;  %v1574_v52 = vmul.f32 %v2537_v51, %v1540_v29  ;;  %v1575_v31 = vmul.f32 %v2044_v38, %v1544_v30  ;;  %1932 = vmatprep.subr.mxu0 %v2217_v7 }
 0x573   : > { %v1577_v33 = vmul.f32 %v2048_v19, %v1552_v32  ;;  %v1578_v23 = vmul.f32 %v2050_v44, %v1556_v2  ;;  %v1560_v48 = vrot.slane %v2056_v14, %v2403_v28  ;;  %v1580_v51 = vmul.f32 %v2054_v34, %v1564_v36  ;;  %1933 = vmatpush3.msra.mxu0 %v1687_v37  ;;  %v1054_v28 = vpop.permute.xlu0 %1053 }
 0x574   : > { %1598 = vperm.xlu1 %2032, %v1576_v22   ;;  %1583 = vperm.xlu0 %2031, %v1573_v24  }
 0x575   : > { %v1579_v25 = vmul.f32 %v2052_v45, %v1560_v48  ;;  %1934 = vmatprep.subr.mxu0 %v2217_v7 }
 0x576   : > { %1935 = vmatpush3.msra.mxu0 %v1686_v21 }
 0x577   : > { %1936 = vmatprep.subr.mxu0 %v2217_v7  ;;  %v1057_v20 = vpop.permute.xlu0 %1056 }
 0x578   : > { %1588 = vperm.xlu0 %2031, %v1574_v52   ;;  %1937 = vmatpush3.msra.mxu0 %v1685_v26  ;;  %v1072_v44 = vcombine.low %v2541_v35, %v1057_v20  ;;  %v1073_v59 = vcombine.high %v2541_v35, %v1057_v20 }
 0x57a   : > { %v1080_v7 = vrot.slane %v1072_v44, %v2458_v61 }
 0x57b   : > { %v1060_v16 = vpop.permute.xlu0 %1059 }
 0x57c   : > { %1593 = vperm.xlu0 %2031, %v1575_v31   ;;  %v1088_v42 = vcombine.low %v1054_v28, %v1060_v16  ;;  %v1089_v54 = vcombine.high %v1054_v28, %v1060_v16 }
 0x57e   : > { %v1096_v34 = vrot.slane %v1088_v42, %v2458_v61  ;;  %v1103_v1 = vrot.slane %v1089_v54, %v2458_v61 }
 0x57f   : > { %v1064_v38 = vpop.permute.xlu0 %1063 }
 0x580   : > { %1603 = vperm.xlu0 %2031, %v1577_v33   ;;  %v1136_v49 = vcombine.low %v1080_v7, %v1096_v34  ;;  %v1137_v58 = vcombine.high %v1080_v7, %v1096_v34 }
 0x582   : > { %v1144_v62 = vrot.slane %v1136_v49, %v2468_v18  ;;  %v1151_v5 = vrot.slane %v1137_v58, %v2468_v18 }
 0x583   : > { %v1067_v39 = vpop.permute.xlu0 %1066 }
 0x584   : > { %1608 = vperm.xlu0 %2031, %v1578_v23   ;;  %v1104_v19 = vcombine.low %v2551_v43, %v1067_v39  ;;  %v1105_v56 = vcombine.high %v2551_v43, %v1067_v39  ;;  %v1087_v43 = vrot.slane %v1073_v59, %v2458_v61 }
 0x586   : > { %v1112_v46 = vrot.slane %v1104_v19, %v2458_v61  ;;  %v1119_v3 = vrot.slane %v1105_v56, %v2458_v61  ;;  %v1152_v12 = vcombine.low %v1087_v43, %v1103_v1 }
 0x587   : > { %v1070_v40 = vpop.permute.xlu0 %1069 }
 0x588   : > { %1613 = vperm.xlu0 %2031, %v1579_v25   ;;  %v1120_v41 = vcombine.low %v1064_v38, %v1070_v40  ;;  %v1121_v50 = vcombine.high %v1064_v38, %v1070_v40 }
 0x58a   : > { %v1128_v45 = vrot.slane %v1120_v41, %v2458_v61  ;;  %v1135_v60 = vrot.slane %v1121_v50, %v2458_v61  ;;  %v1160_v61 = vrot.slane %v1152_v12, %v2468_v18 }
 0x58c   : > { %1618 = vperm.xlu0 %2031, %v1580_v51   ;;  %v1168_v47 = vcombine.low %v1112_v46, %v1128_v45  ;;  %v1169_v53 = vcombine.high %v1112_v46, %v1128_v45  ;;  %v1184_v6 = vcombine.low %v1119_v3, %v1135_v60  ;;  %v1185_v33 = vcombine.high %v1119_v3, %v1135_v60 }
 0x58d   : > { %v1153_v51 = vcombine.high %v1087_v43, %v1103_v1 }
 0x58e   : > { %v1176_v57 = vrot.slane %v1168_v47, %v2468_v18  ;;  %v1183_v63 = vrot.slane %v1169_v53, %v2468_v18  ;;  %v1192_v24 = vrot.slane %v1184_v6, %v2468_v18  ;;  %v1199_v16 = vrot.slane %v1185_v33, %v2468_v18 }
 0x58f   : > { %v1167_v44 = vrot.slane %v1153_v51, %v2468_v18 }
 0x590   : > { %v1200_v4 = vcombine.low %v1144_v62, %v1176_v57  ;;  %v1201_v35 = vcombine.high %v1144_v62, %v1176_v57  ;;  %v1203_v10 = vcombine.high %v1151_v5, %v1183_v63  ;;  %v1202_v22 = vcombine.low %v1151_v5, %v1183_v63 }
 0x591   : > { %v1204_v23 = vcombine.low %v1160_v61, %v1192_v24  ;;  %v1205_v20 = vcombine.high %v1160_v61, %v1192_v24  ;;  %v1206_v7 = vcombine.low %v1167_v44, %v1199_v16  ;;  %v1207_v62 = vcombine.high %v1167_v44, %v1199_v16 }
 0x5ef   : > { %v1584_v0 = vpop.permute.xlu0 %1583  ;;  %v1599_v8 = vpop.permute.xlu1 %1598 }
 0x5f0   : > { %v1621_v9 = vmul.f32 %v1584_v0, %v1200_v4  ;;  %v1624_v14 = vmul.f32 %v1599_v8, %v1203_v10 }
 0x5f2   : > { %v1629_v15 = vsel %vm455_vm1, %v1621_v9, 0.0  ;;  %v1650_v31 = vsel %vm455_vm1, %v1624_v14, 0.0 }
 0x5f3   : > { %v1589_v11 = vpop.permute.xlu0 %1588  ;;  %v1630_v32 = vrot.slane %v1629_v15, 4  ;;  %v1651_v27 = vrot.slane %v1650_v31, 4 }
 0x5f4   : > { %v1622_v13 = vmul.f32 %v1589_v11, %v1201_v35 }
 0x5f5   : > { %v1631_v21 = vadd.f32 %v1630_v32, %v1629_v15  ;;  %v1652_v41 = vadd.f32 %v1651_v27, %v1650_v31 }
 0x5f6   : > { %v1636_v17 = vsel %vm455_vm1, %v1622_v13, 0.0 }
 0x5f7   : > { %v1637_v29 = vrot.slane %v1636_v17, 4  ;;  %v1594_v52 = vpop.permute.xlu0 %1593  ;;  %v1632_v45 = vrot.slane %v1631_v21, 2  ;;  %v1653_v53 = vrot.slane %v1652_v41, 2 }
 0x5f8   : > { %v1623_v30 = vmul.f32 %v1594_v52, %v1202_v22 }
 0x5f9   : > { %v1638_v48 = vadd.f32 %v1637_v29, %v1636_v17  ;;  %v1633_v58 = vadd.f32 %v1632_v45, %v1631_v21  ;;  %v1654_v3 = vadd.f32 %v1653_v53, %v1652_v41 }
 0x5fa   : > { %v1643_v2 = vsel %vm455_vm1, %v1623_v30, 0.0 }
 0x5fb   : > { %v1644_v25 = vrot.slane %v1643_v2, 4  ;;  %v1604_v36 = vpop.permute.xlu0 %1603  ;;  %v1639_v38 = vrot.slane %v1638_v48, 2  ;;  %v1634_v6 = vrot.slane %v1633_v58, 1  ;;  %v1655_v13 = vrot.slane %v1654_v3, 1 }
 0x5fc   : > { %v1625_v37 = vmul.f32 %v1604_v36, %v1204_v23 }
 0x5fd   : > { %v1645_v26 = vadd.f32 %v1644_v25, %v1643_v2  ;;  %v1640_v47 = vadd.f32 %v1639_v38, %v1638_v48  ;;  %v1635_v17 = vadd.f32 %v1634_v6, %v1633_v58  ;;  %v1656_v33 = vadd.f32 %v1655_v13, %v1654_v3 }
 0x5fe   : > { %v1657_v28 = vsel %vm455_vm1, %v1625_v37, 0.0 }
 0x5ff   : > { %v1658_v39 = vrot.slane %v1657_v28, 4  ;;  %v1609_v40 = vpop.permute.xlu0 %1608  ;;  %v1646_v42 = vrot.slane %v1645_v26, 2  ;;  %v1641_v63 = vrot.slane %v1640_v47, 1 }
 0x600   : > { %v1626_v19 = vmul.f32 %v1609_v40, %v1205_v20 }
 0x601   : > { %v1659_v34 = vadd.f32 %v1658_v39, %v1657_v28  ;;  %v1647_v54 = vadd.f32 %v1646_v42, %v1645_v26  ;;  %v1642_v10 = vadd.f32 %v1641_v63, %v1640_v47  ;;  %v1903_v28 = vld [vmem:[%s2671_s7] ss:$0 sm:$0xff] }
 0x602   : > { %v1664_v46 = vsel %vm455_vm1, %v1626_v19, 0.0 }
 0x603   : > { %v1665_v49 = vrot.slane %v1664_v46, 4  ;;  %v1614_v50 = vpop.permute.xlu0 %1613  ;;  %v1660_v56 = vrot.slane %v1659_v34, 2  ;;  %v1648_v4 = vrot.slane %v1647_v54, 1  ;;  %v1704_v52 = vsel %vm1372_vm2, %v1642_v10, %v1635_v17 }
 0x604   : > { %v1627_v57 = vmul.f32 %v1614_v50, %v1206_v7 }
 0x605   : > { %v1666_v59 = vadd.f32 %v1665_v49, %v1664_v46  ;;  %v1661_v5 = vadd.f32 %v1660_v56, %v1659_v34  ;;  %v1649_v14 = vadd.f32 %v1648_v4, %v1647_v54 }
 0x606   : > { %v1671_v60 = vsel %vm455_vm1, %v1627_v57, 0.0 }
 0x607   : > { %v1667_v0 = vrot.slane %v1666_v59, 2  ;;  %v1672_v18 = vrot.slane %v1671_v60, 4  ;;  %v1619_v1 = vpop.permute.xlu0 %1618  ;;  %v1662_v15 = vrot.slane %v1661_v5, 1  ;;  %v1705_v31 = vsel %vm1374_vm3, %v1649_v14, %v1704_v52 }
 0x608   : > { %v1628_v43 = vmul.f32 %v1619_v1, %v1207_v62  ;;  %v1706_v25 = vsel %vm1376_vm4, %v1656_v33, %v1705_v31 }
 0x609   : > { %v1668_v8 = vadd.f32 %v1667_v0, %v1666_v59  ;;  %v1673_v9 = vadd.f32 %v1672_v18, %v1671_v60  ;;  %v1663_v32 = vadd.f32 %v1662_v15, %v1661_v5 }
 0x60a   : > { %v1678_v35 = vsel %vm455_vm1, %v1628_v43, 0.0 }
 0x60b   : > { %v1674_v11 = vrot.slane %v1673_v9, 2  ;;  %v1679_v12 = vrot.slane %v1678_v35, 4  ;;  %v1669_v22 = vrot.slane %v1668_v8, 1  ;;  %v1707_v51 = vsel %vm1378_vm5, %v1663_v32, %v1706_v25 }
 0x60d   : > { %v1675_v24 = vadd.f32 %v1674_v11, %v1673_v9  ;;  %v1680_v29 = vadd.f32 %v1679_v12, %v1678_v35  ;;  %v1670_v2 = vadd.f32 %v1669_v22, %v1668_v8 }
 0x60f   : > { %v1676_v30 = vrot.slane %v1675_v24, 1  ;;  %v1681_v61 = vrot.slane %v1680_v29, 2  ;;  %v1708_v37 = vsel %vm1380_vm6, %v1670_v2, %v1707_v51 }
 0x611   : > { %v1682_v23 = vadd.f32 %v1681_v61, %v1680_v29  ;;  %v1677_v48 = vadd.f32 %v1676_v30, %v1675_v24 }
 0x613   : > { %v1683_v36 = vrot.slane %v1682_v23, 1  ;;  %v1709_v21 = vsel %vm1382_vm7, %v1677_v48, %v1708_v37 }
 0x615   : > { %v1684_v27 = vadd.f32 %v1683_v36, %v1682_v23 }
 0x617   : > { %v1710_v26 = vsel %vm1384_vm8, %v1684_v27, %v1709_v21 }
 0x618   : > { %1939 = vmatmul.mubr.msk.f32.vlgmr.msra.gmra.mxu0 %vm455_vm1, %v1710_v26 }
 0x6d8   : > { %v1779_v20 = vpop.f32.mrf.mxu0 }
 0x6d9   : > { %v1780_v16 = vadd.f32 %v1903_v28, %v1779_v20 }
 0x6da   : > { %v1940_v38 = vpop.f32.mrf.mxu0 }
 0x6db   : > { %v1783_v39 = vadd.f32 %v2421_v55, %v1780_v16 }
 0x6dd   : > { %1784 = vst.msk [vmem:[%s340_s19] sm:$0xff] %vm455_vm1, %v1783_v39 }
 0x6de   : > { %2148 = shalt.err (!%p2145_p11)
}
 0x6df   : > { %s2149_s18 = scalar_lea.hbm %s1797_s10, 128  ;;  %s2153_s23 = scalar_lea.hbm %s2672_s8, 256 }
 0x6e0   : > { %p2150_p0 = scmp.ne.s32.totalorder %s1797_s10, %s2149_s18  ;;  %p2154_p3 = scmp.lt.s32.totalorder %s1797_s10, %s2672_s8 }
 0x6e1   : > { %p2155_p2 = scmp.lt.s32.totalorder %s2153_s23, %s2149_s18 }
 0x6e2   : > { %p2151_p1 = pnand %p2150_p0, %p2309_p5 }
 0x6e3   : > { %p2156_p4 = por %p2155_p2, %p2154_p3 }
 0x6e4   : > { %p2152_p13 = pneg %p2151_p1 }
 0x6e6   : > { %p2157_p10 = pnand %p2156_p4, %p2152_p13 }
 0x6e8   : > { %2160 = shalt.err (!%p2157_p10)
}
 0x6e9   : > { %1953 = dma.vmem_to_hbm [thread:$0]  (%p2309_p5), %s1800_s24, 128, %s1797_s10, %s1786_s12  }
 0x6ea PF: > { %p1975_p12 = scmp.ge.s32.totalorder %s2203_s30, 2  ;;  %s1811_s26 = sand.u32 1, %s2191_s27  }
 0x6eb   : > { %p2682_p7 = scmp.ne.s32.totalorder %s2675_s16, 0  ;;  %s1812_s22 = scalar_lea.sflag [#allocation4], %s1811_s26 }
 0x6ed   : > { %p1966_p6 = pnand %p1975_p12, %p2682_p7 }
 0x6ef   : > { %p1967_p9 = pneg %p1966_p6 }
 0x6f1   : > { %2186 = dma.done.wait (%p1967_p9), %s1812_s22, 128  }
 0x6f2   : > { %2188 = vsyncadd (%p1967_p9), %s1812_s22, 4294967168  ;;  %p20_p8 = scmp.ge.s32.totalorder %s2296_s11, 4   ;;  %s2683_s27 = smov %s2195_s28 }
 0x6f3   : > { %s2684_s28 = smov %s2199_s29  ;;  %s2685_s29 = smov %s2307_s14 }
 0x6f4   : > { %s2686_s30 = smov %s2296_s11  ;;  %22 = sbr.rel (!%p20_p8) target bundleno = 5 (0x5), region = 100 }
 0x6f9   :  { %1817 = vsyncpa [#allocation3], 1 }
 0x6fa   :  { %1819 = vsyncpa [#allocation3 + $0x1], 1 }
 0x6fb   :  { %1820 = vsyncpa [#allocation6], 1 }
 0x6fc   :  { %1821 = vsyncpa [#allocation4], 1 }
 0x6fd   :  { %1823 = vsyncpa [#allocation4 + $0x1], 1 }

</bundles_post_ra>
